<compile_context>
chip_gen: v7x
topology: tpu7x:2x2x1
jax: 0.10.0
libtpu: 0.0.40
codegen_flags: <defaults>
</compile_context>

<pallas_src>
import functools

import jax
import jax.numpy as jnp
from jax.experimental import pallas as pl
from jax.experimental.pallas import tpu as pltpu

BN_EPS = 1e-5


# ---------------------------------------------------------------------------
# Kernel 1: tiled global-average-pool + BatchNorm1d bottleneck.
# grid = (channel_tiles [parallel], spatial_tiles [arbitrary / reduction])
# ---------------------------------------------------------------------------
def _pool_bn_kernel(x1_ref, x2_ref, x3_ref, gamma_ref, beta_ref,
                    g1_ref, g2_ref, g3_ref,
                    f1_ref, f2_ref, f3_ref,
                    fb1_ref, fb2_ref, fb3_ref,
                    *, inv_s):
    s = pl.program_id(1)
    x_refs = (x1_ref, x2_ref, x3_ref)
    g_refs = (g1_ref, g2_ref, g3_ref)
    f_refs = (f1_ref, f2_ref, f3_ref)
    fb_refs = (fb1_ref, fb2_ref, fb3_ref)

    # fp32 accumulators are the dense (B, tc) gfeat output blocks themselves
    # (resident across the spatial axis, fully packed sublanes).
    @pl.when(s == 0)
    def _init():
        for g in g_refs:
            g[...] = jnp.zeros_like(g)

    # Partial spatial sums for this tile: read bf16, accumulate fp32.
    for x, g in zip(x_refs, g_refs):
        g[...] += jnp.sum(x[...].astype(jnp.float32), axis=1)

    # Finalize: scale by 1/S once, then BatchNorm1d in training mode (biased
    # batch statistics over the batch axis, per channel).  Also emit the bf16
    # copy of feat consumed directly by the classifier kernel.
    @pl.when(s == pl.num_programs(1) - 1)
    def _finalize():
        for i in range(3):
            mean_bc = g_refs[i][...] * inv_s                 # (B, tc) GAP
            g_refs[i][...] = mean_bc
            mu = jnp.mean(mean_bc, axis=0, keepdims=True)    # (1, tc)
            var = jnp.mean((mean_bc - mu) ** 2, axis=0, keepdims=True)
            norm = (mean_bc - mu) * jax.lax.rsqrt(var + BN_EPS)
            out = norm * gamma_ref[i:i + 1, :] + beta_ref[i:i + 1, :]
            f_refs[i][...] = out
            fb_refs[i][...] = out.astype(fb_refs[i].dtype)


# ---------------------------------------------------------------------------
# Kernel 2: bias-free classifier, bf16 operands on the MXU, fp32 accumulate,
# lane-dense (128-padded) output tiles.
# ---------------------------------------------------------------------------
def _classifier_kernel(feat_ref, w_ref, cls_ref):
    cls_ref[...] = jnp.dot(feat_ref[...], w_ref[...],
                           preferred_element_type=jnp.float32)


# ---------------------------------------------------------------------------
# Tiling helpers
# ---------------------------------------------------------------------------
def _tpu_generation_params():
    """Returns (split_channels, vmem_limit_bytes) for the local TPU generation."""
    try:
        kind = jax.devices()[0].device_kind.lower()
    except Exception:
        kind = ""
    if "v5" in kind or "v6" in kind:
        # Single TensorCore per chip, 128 MiB physical VMEM: no channel split,
        # generous scoped limit so the spatial tile can grow.
        return False, 64 << 20
    if "v7" in kind or "7x" in kind:
        # Two TensorCores per chip but only 64 MiB VMEM per TC: split channels
        # across the "parallel" axis, keep the footprint under ~48 MiB.
        return True, 48 << 20
    # Unknown chip: conservative single-core defaults.
    return False, 32 << 20


def _pick_spatial_tile(batch, spatial, tc, itemsize, budget_bytes):
    """Largest spatial tile dividing S whose 3-stream double buffer fits budget."""
    row_mult = max(8, 32 // itemsize)            # 8 rows f32, 16 bf16, 32 int8
    per_row = 3 * 2 * batch * tc * itemsize      # 3 streams x 2 pipeline buffers
    ts_max = max(row_mult, int(budget_bytes) // per_row)
    if spatial <= ts_max:
        return spatial                           # whole reduction in one step
    start = (ts_max // row_mult) * row_mult
    for cand in range(start, 0, -row_mult):      # largest row-aligned divisor
        if spatial % cand == 0:
            return cand
    for cand in range(min(ts_max, spatial), 0, -1):   # any divisor fallback
        if spatial % cand == 0:
            return cand
    return spatial


def prepare_classifier_weight(weight):
    """One-time prep of the classifier weight (call at parameter-setup time).

    (num_classes, 3C) -> (3C, n_pad) bf16 with n_pad = round_up(num_classes, 128)
    so the classifier kernel's output stores are lane-dense and no per-forward
    transpose/pad/cast HBM pass is needed.
    """
    n, _ = weight.shape
    n_pad = ((n + 127) // 128) * 128
    w_t = jnp.transpose(weight).astype(jnp.bfloat16)
    if n_pad != n:
        w_t = jnp.pad(w_t, ((0, 0), (0, n_pad - n)))
    return w_t


# ---------------------------------------------------------------------------
# Forward wrapper
# ---------------------------------------------------------------------------
def backbone_head(x1, x2, x3, gamma, beta, classifier_weight_t, num_classes,
                  *, spatial_tile=None):
    """Pallas forward of the Backbone head.

    x1, x2, x3          : (B, H, W, C) NHWC trunk feature maps (bf16 preferred).
    gamma, beta         : (3C,) BatchNorm1d bottleneck affine parameters.
    classifier_weight_t : (3C, n_pad) bf16 weight from prepare_classifier_weight
                          (prepared ONCE, not per forward call).
    num_classes         : logical number of classes (<= n_pad).

    Returns (cls_score, (global_feat, gfeat1, gfeat2, gfeat3), feat):
      * training branch of the module -> (cls_score, [global_feat, gf1, gf2, gf3])
      * eval, neck_feat == 'after'    -> feat
      * eval, otherwise               -> global_feat
    """
    B, H, W, C = x1.shape
    S = H * W
    k3c = 3 * C
    assert gamma.shape == (k3c,) and beta.shape == (k3c,)
    assert classifier_weight_t.shape[0] == k3c
    n_pad = classifier_weight_t.shape[1]
    assert n_pad % 128 == 0 and n_pad >= num_classes

    # NHWC -> (B, S, C): free reshape (channels on lanes, spatial on sublanes).
    xs = tuple(x.reshape(B, S, C) for x in (x1, x2, x3))
    itemsize = jnp.dtype(x1.dtype).itemsize

    split_channels, vmem_limit = _tpu_generation_params()
    tc = C // 2 if (split_channels and C % 256 == 0) else C

    # Budget the pipelined input buffers against the scoped VMEM limit minus
    # the blocks that stay resident across the spatial (reduction) axis.
    resident = 3 * B * tc * (4 + 4 + 2) * 2      # gfeat/feat f32 + feat bf16, x2
    resident += 2 * 3 * tc * 4 * 2               # gamma / beta blocks
    budget = max(1 << 20, vmem_limit - resident - (2 << 20))
    ts = (spatial_tile if spatial_tile is not None
          else _pick_spatial_tile(B, S, tc, itemsize, budget))
    assert S % ts == 0, f"spatial tile {ts} must divide H*W={S}"

    gamma3 = gamma.reshape(3, C).astype(jnp.float32)
    beta3 = beta.reshape(3, C).astype(jnp.float32)

    x_spec = pl.BlockSpec((B, ts, tc), lambda c, s: (0, s, c))
    p_spec = pl.BlockSpec((3, tc), lambda c, s: (0, c))       # constant over s
    acc_spec = pl.BlockSpec((B, tc), lambda c, s: (0, c))     # resident over s

    out_shapes = (
        tuple(jax.ShapeDtypeStruct((B, C), jnp.float32) for _ in range(3))     # gfeat
        + tuple(jax.ShapeDtypeStruct((B, C), jnp.float32) for _ in range(3))   # feat
        + tuple(jax.ShapeDtypeStruct((B, C), jnp.bfloat16) for _ in range(3))  # feat bf16
    )

    cost1 = pl.CostEstimate(
        flops=3 * B * S * C + 10 * 3 * B * C,
        transcendentals=3 * C,
        bytes_accessed=3 * B * S * C * itemsize + 3 * B * C * (4 + 4 + 2)
        + 2 * k3c * 4)

    outs = pl.pallas_call(
        functools.partial(_pool_bn_kernel, inv_s=1.0 / S),
        out_shape=out_shapes,
        grid_spec=pltpu.PrefetchScalarGridSpec(
            num_scalar_prefetch=0,
            grid=(C // tc, S // ts),
            in_specs=[x_spec, x_spec, x_spec, p_spec, p_spec],
            out_specs=[acc_spec] * 9,
        ),
        compiler_params=pltpu.CompilerParams(
            dimension_semantics=("parallel", "arbitrary"),
            vmem_limit_bytes=vmem_limit),
        cost_estimate=cost1,
    )(xs[0], xs[1], xs[2], gamma3, beta3)

    g1, g2, g3, f1, f2, f3, fb1, fb2, fb3 = outs
    global_feat = jnp.concatenate([g1, g2, g3], axis=1)   # == cat([gf1,gf2,gf3],1)
    feat = jnp.concatenate([f1, f2, f3], axis=1)
    feat_b = jnp.concatenate([fb1, fb2, fb3], axis=1)      # bf16, MXU operand

    # ---- classifier: Linear(3C -> num_classes, bias=False) ----
    tn = next(k for k in (512, 256, 128) if n_pad % k == 0)
    cost2 = pl.CostEstimate(
        flops=2 * B * k3c * n_pad,
        transcendentals=0,
        bytes_accessed=k3c * n_pad * 2 + B * k3c * 2 + B * n_pad * 4)

    cls_pad = pl.pallas_call(
        _classifier_kernel,
        out_shape=jax.ShapeDtypeStruct((B, n_pad), jnp.float32),
        grid_spec=pltpu.PrefetchScalarGridSpec(
            num_scalar_prefetch=0,
            grid=(n_pad // tn,),
            in_specs=[pl.BlockSpec((B, k3c), lambda n: (0, 0)),
                      pl.BlockSpec((k3c, tn), lambda n: (0, n))],
            out_specs=pl.BlockSpec((B, tn), lambda n: (0, n)),
        ),
        compiler_params=pltpu.CompilerParams(
            dimension_semantics=("parallel",),
            vmem_limit_bytes=32 * 1024 * 1024),
        cost_estimate=cost2,
    )(feat_b, classifier_weight_t)
    cls_score = cls_pad[:, :num_classes] if n_pad != num_classes else cls_pad

    return cls_score, (global_feat, g1, g2, g3), feat


# ---------------------------------------------------------------------------
# Pure-JAX fp32 reference of the training-branch forward.
# ---------------------------------------------------------------------------
def _reference(x1, x2, x3, gamma, beta, weight):
    def gap(x):  # NHWC global average pool -> (B, C)
        x = x.astype(jnp.float32)
        return jnp.mean(x.reshape(x.shape[0], -1, x.shape[-1]), axis=1)
    g1, g2, g3 = gap(x1), gap(x2), gap(x3)
    gfeat = jnp.concatenate([g1, g2, g3], axis=1)
    mu = jnp.mean(gfeat, axis=0, keepdims=True)
    var = jnp.mean((gfeat - mu) ** 2, axis=0, keepdims=True)
    feat = (gfeat - mu) / jnp.sqrt(var + BN_EPS) * gamma[None, :] + beta[None, :]
    cls = feat @ weight.T.astype(jnp.float32)
    return cls, gfeat, (g1, g2, g3), feat


if __name__ == "__main__":
    # Small shapes consistent with the module (real scale: B=64, C=2048, S~128):
    #   B=8 (full-dim batch blocks), C=256 (128-lane multiple, splittable on
    #   v7x), S=64 with spatial_tile=16 -> 4 reduction steps exercising the
    #   resident fp32 accumulator path with bf16-native 16-row tiles.
    B, C, H, W = 8, 256, 8, 8
    NUM_CLASSES = 16            # padded to 128 lanes in prepare_classifier_weight

    key = jax.random.PRNGKey(0)
    k1, k2, k3, kw = jax.random.split(key, 4)
    # Backbone activations in their native bf16, NHWC (TPU-native) layout.
    x1 = jax.random.normal(k1, (B, H, W, C), dtype=jnp.float32).astype(jnp.bfloat16)
    x2 = jax.random.normal(k2, (B, H, W, C), dtype=jnp.float32).astype(jnp.bfloat16)
    x3 = jax.random.normal(k3, (B, H, W, C), dtype=jnp.float32).astype(jnp.bfloat16)

    # Parameter init matching the module's __init__:
    #   classifier Linear(3C, num_classes, bias=False), weight ~ N(0, 0.001)
    #   bottleneck BatchNorm1d(3C): weight = 1, bias = 0
    weight = 0.001 * jax.random.normal(kw, (NUM_CLASSES, 3 * C), dtype=jnp.float32)
    gamma = jnp.ones((3 * C,), dtype=jnp.float32)
    beta = jnp.zeros((3 * C,), dtype=jnp.float32)

    # Hoisted one-time weight preparation (not part of the per-forward path).
    weight_t = prepare_classifier_weight(weight)

    cls_score, (global_feat, gf1, gf2, gf3), feat = backbone_head(
        x1, x2, x3, gamma, beta, weight_t, NUM_CLASSES, spatial_tile=16)
    jax.block_until_ready((cls_score, global_feat, gf1, gf2, gf3, feat))

    ref_cls, ref_gfeat, (rg1, rg2, rg3), ref_feat = _reference(
        x1, x2, x3, gamma, beta, weight)

    # global_feat: identical bf16 inputs, fp32 accumulation -> tight tolerance.
    assert jnp.allclose(global_feat, ref_gfeat, atol=1e-5, rtol=1e-5), "global_feat mismatch"
    assert jnp.allclose(gf1, rg1, atol=1e-5, rtol=1e-5), "global_feat1 mismatch"
    assert jnp.allclose(gf2, rg2, atol=1e-5, rtol=1e-5), "global_feat2 mismatch"
    assert jnp.allclose(gf3, rg3, atol=1e-5, rtol=1e-5), "global_feat3 mismatch"
    # feat: BN's rsqrt(var + eps) amplifies fp32 reduction-order noise on
    # low-variance channels -> modest tolerance (values are O(1)).
    assert jnp.allclose(feat, ref_feat, atol=2e-3, rtol=1e-3), "feat mismatch"
    # cls_score: bf16 MXU operands (fp32 accumulation) vs fp32 reference.
    assert jnp.allclose(cls_score, ref_cls, atol=5e-3, rtol=5e-2), "cls_score mismatch"

    print("KERNEL_OK")
</pallas_src>

<mosaic_0001>
module attributes {stable_mosaic.version = 11 : i64} {
  func.func @_pool_bn_kernel(%arg0: i32, %arg1: i32, %arg2: memref<8x16x256xbf16, #tpu.memory_space<vmem>>, %arg3: memref<8x16x256xbf16, #tpu.memory_space<vmem>>, %arg4: memref<8x16x256xbf16, #tpu.memory_space<vmem>>, %arg5: memref<3x256xf32, #tpu.memory_space<vmem>>, %arg6: memref<3x256xf32, #tpu.memory_space<vmem>>, %arg7: memref<8x256xf32, #tpu.memory_space<vmem>>, %arg8: memref<8x256xf32, #tpu.memory_space<vmem>>, %arg9: memref<8x256xf32, #tpu.memory_space<vmem>>, %arg10: memref<8x256xf32, #tpu.memory_space<vmem>>, %arg11: memref<8x256xf32, #tpu.memory_space<vmem>>, %arg12: memref<8x256xf32, #tpu.memory_space<vmem>>, %arg13: memref<8x256xbf16, #tpu.memory_space<vmem>>, %arg14: memref<8x256xbf16, #tpu.memory_space<vmem>>, %arg15: memref<8x256xbf16, #tpu.memory_space<vmem>>) attributes {dimension_semantics = [#tpu.dimension_semantics<parallel>, #tpu.dimension_semantics<arbitrary>], iteration_bounds = array<i64: 1, 4>, scalar_prefetch = 0 : i64, scratch_operands = 0 : i64, tpu.core_type = #tpu.core_type<tc>, window_params = [{transform_indices = @transform_0, window_bounds = array<i64: 8, 16, 256>}, {transform_indices = @transform_1, window_bounds = array<i64: 8, 16, 256>}, {transform_indices = @transform_2, window_bounds = array<i64: 8, 16, 256>}, {transform_indices = @transform_3, window_bounds = array<i64: 3, 256>}, {transform_indices = @transform_4, window_bounds = array<i64: 3, 256>}, {transform_indices = @transform_5, window_bounds = array<i64: 8, 256>}, {transform_indices = @transform_6, window_bounds = array<i64: 8, 256>}, {transform_indices = @transform_7, window_bounds = array<i64: 8, 256>}, {transform_indices = @transform_8, window_bounds = array<i64: 8, 256>}, {transform_indices = @transform_9, window_bounds = array<i64: 8, 256>}, {transform_indices = @transform_10, window_bounds = array<i64: 8, 256>}, {transform_indices = @transform_11, window_bounds = array<i64: 8, 256>}, {transform_indices = @transform_12, window_bounds = array<i64: 8, 256>}, {transform_indices = @transform_13, window_bounds = array<i64: 8, 256>}]} {
    %c0_i32 = arith.constant 0 : i32
    %0 = arith.cmpi eq, %arg1, %c0_i32 : i32
    %1 = arith.extui %0 : i1 to i32
    %c0_i32_0 = arith.constant 0 : i32
    %2 = arith.cmpi ne, %1, %c0_i32_0 : i32
    scf.if %2 {
      %cst_24 = arith.constant 0.000000e+00 : f32
      %24 = vector.broadcast %cst_24 : f32 to vector<8x256xf32>
      %c0_25 = arith.constant 0 : index
      %c0_26 = arith.constant 0 : index
      %25 = vector.load %arg7[%c0_25, %c0_26] : memref<8x256xf32, #tpu.memory_space<vmem>>, vector<8x256xf32>
      tpu.vector_store %arg7[%c0_25, %c0_26], %24 {strides = array<i32>} : memref<8x256xf32, #tpu.memory_space<vmem>>, vector<8x256xf32>,
      %cst_27 = arith.constant 0.000000e+00 : f32
      %26 = vector.broadcast %cst_27 : f32 to vector<8x256xf32>
      %c0_28 = arith.constant 0 : index
      %c0_29 = arith.constant 0 : index
      %27 = vector.load %arg8[%c0_28, %c0_29] : memref<8x256xf32, #tpu.memory_space<vmem>>, vector<8x256xf32>
      tpu.vector_store %arg8[%c0_28, %c0_29], %26 {strides = array<i32>} : memref<8x256xf32, #tpu.memory_space<vmem>>, vector<8x256xf32>,
      %cst_30 = arith.constant 0.000000e+00 : f32
      %28 = vector.broadcast %cst_30 : f32 to vector<8x256xf32>
      %c0_31 = arith.constant 0 : index
      %c0_32 = arith.constant 0 : index
      %29 = vector.load %arg9[%c0_31, %c0_32] : memref<8x256xf32, #tpu.memory_space<vmem>>, vector<8x256xf32>
      tpu.vector_store %arg9[%c0_31, %c0_32], %28 {strides = array<i32>} : memref<8x256xf32, #tpu.memory_space<vmem>>, vector<8x256xf32>,
    } else {
    }
    %c0 = arith.constant 0 : index
    %c0_1 = arith.constant 0 : index
    %3 = vector.load %arg7[%c0, %c0_1] : memref<8x256xf32, #tpu.memory_space<vmem>>, vector<8x256xf32>
    %c0_2 = arith.constant 0 : index
    %c0_3 = arith.constant 0 : index
    %c0_4 = arith.constant 0 : index
    %4 = vector.load %arg2[%c0_2, %c0_3, %c0_4] : memref<8x16x256xbf16, #tpu.memory_space<vmem>>, vector<8x16x256xbf16>
    %5 = arith.extf %4 : vector<8x16x256xbf16> to vector<8x16x256xf32>
    %cst = arith.constant dense<0.000000e+00> : vector<8x256xf32>
    %6 = vector.multi_reduction <add>, %5, %cst [1] : vector<8x16x256xf32> to vector<8x256xf32>
    %7 = arith.addf %3, %6 : vector<8x256xf32>
    %c0_5 = arith.constant 0 : index
    %c0_6 = arith.constant 0 : index
    %8 = vector.load %arg7[%c0_5, %c0_6] : memref<8x256xf32, #tpu.memory_space<vmem>>, vector<8x256xf32>
    tpu.vector_store %arg7[%c0_5, %c0_6], %7 {strides = array<i32>} : memref<8x256xf32, #tpu.memory_space<vmem>>, vector<8x256xf32>,
    %c0_7 = arith.constant 0 : index
    %c0_8 = arith.constant 0 : index
    %9 = vector.load %arg8[%c0_7, %c0_8] : memref<8x256xf32, #tpu.memory_space<vmem>>, vector<8x256xf32>
    %c0_9 = arith.constant 0 : index
    %c0_10 = arith.constant 0 : index
    %c0_11 = arith.constant 0 : index
    %10 = vector.load %arg3[%c0_9, %c0_10, %c0_11] : memref<8x16x256xbf16, #tpu.memory_space<vmem>>, vector<8x16x256xbf16>
    %11 = arith.extf %10 : vector<8x16x256xbf16> to vector<8x16x256xf32>
    %cst_12 = arith.constant dense<0.000000e+00> : vector<8x256xf32>
    %12 = vector.multi_reduction <add>, %11, %cst_12 [1] : vector<8x16x256xf32> to vector<8x256xf32>
    %13 = arith.addf %9, %12 : vector<8x256xf32>
    %c0_13 = arith.constant 0 : index
    %c0_14 = arith.constant 0 : index
    %14 = vector.load %arg8[%c0_13, %c0_14] : memref<8x256xf32, #tpu.memory_space<vmem>>, vector<8x256xf32>
    tpu.vector_store %arg8[%c0_13, %c0_14], %13 {strides = array<i32>} : memref<8x256xf32, #tpu.memory_space<vmem>>, vector<8x256xf32>,
    %c0_15 = arith.constant 0 : index
    %c0_16 = arith.constant 0 : index
    %15 = vector.load %arg9[%c0_15, %c0_16] : memref<8x256xf32, #tpu.memory_space<vmem>>, vector<8x256xf32>
    %c0_17 = arith.constant 0 : index
    %c0_18 = arith.constant 0 : index
    %c0_19 = arith.constant 0 : index
    %16 = vector.load %arg4[%c0_17, %c0_18, %c0_19] : memref<8x16x256xbf16, #tpu.memory_space<vmem>>, vector<8x16x256xbf16>
    %17 = arith.extf %16 : vector<8x16x256xbf16> to vector<8x16x256xf32>
    %cst_20 = arith.constant dense<0.000000e+00> : vector<8x256xf32>
    %18 = vector.multi_reduction <add>, %17, %cst_20 [1] : vector<8x16x256xf32> to vector<8x256xf32>
    %19 = arith.addf %15, %18 : vector<8x256xf32>
    %c0_21 = arith.constant 0 : index
    %c0_22 = arith.constant 0 : index
    %20 = vector.load %arg9[%c0_21, %c0_22] : memref<8x256xf32, #tpu.memory_space<vmem>>, vector<8x256xf32>
    tpu.vector_store %arg9[%c0_21, %c0_22], %19 {strides = array<i32>} : memref<8x256xf32, #tpu.memory_space<vmem>>, vector<8x256xf32>,
    %c3_i32 = arith.constant 3 : i32
    %21 = arith.cmpi eq, %arg1, %c3_i32 : i32
    %22 = arith.extui %21 : i1 to i32
    %c0_i32_23 = arith.constant 0 : i32
    %23 = arith.cmpi ne, %22, %c0_i32_23 : i32
    scf.if %23 {
      %c0_24 = arith.constant 0 : index
      %c0_25 = arith.constant 0 : index
      %24 = vector.load %arg7[%c0_24, %c0_25] : memref<8x256xf32, #tpu.memory_space<vmem>>, vector<8x256xf32>
      %cst_26 = arith.constant 1.562500e-02 : f32
      %25 = vector.broadcast %cst_26 : f32 to vector<8x256xf32>
      %26 = arith.mulf %24, %25 : vector<8x256xf32>
      %c0_27 = arith.constant 0 : index
      %c0_28 = arith.constant 0 : index
      %27 = vector.load %arg7[%c0_27, %c0_28] : memref<8x256xf32, #tpu.memory_space<vmem>>, vector<8x256xf32>
      tpu.vector_store %arg7[%c0_27, %c0_28], %26 {strides = array<i32>} : memref<8x256xf32, #tpu.memory_space<vmem>>, vector<8x256xf32>,
      %cst_29 = arith.constant dense<0.000000e+00> : vector<256xf32>
      %28 = vector.multi_reduction <add>, %26, %cst_29 [0] : vector<8x256xf32> to vector<256xf32>
      %29 = vector.shape_cast %28 : vector<256xf32> to vector<1x256xf32>
      %cst_30 = arith.constant 8.000000e+00 : f32
      %30 = vector.broadcast %cst_30 : f32 to vector<1x256xf32>
      %31 = arith.divf %29, %30 : vector<1x256xf32>
      %32 = vector.broadcast %31 : vector<1x256xf32> to vector<8x256xf32>
      %33 = arith.subf %26, %32 : vector<8x256xf32>
      %34 = arith.mulf %33, %33 : vector<8x256xf32>
      %cst_31 = arith.constant dense<0.000000e+00> : vector<256xf32>
      %35 = vector.multi_reduction <add>, %34, %cst_31 [0] : vector<8x256xf32> to vector<256xf32>
      %36 = vector.shape_cast %35 : vector<256xf32> to vector<1x256xf32>
      %cst_32 = arith.constant 8.000000e+00 : f32
      %37 = vector.broadcast %cst_32 : f32 to vector<1x256xf32>
      %38 = arith.divf %36, %37 : vector<1x256xf32>
      %39 = vector.broadcast %31 : vector<1x256xf32> to vector<8x256xf32>
      %40 = arith.subf %26, %39 : vector<8x256xf32>
      %cst_33 = arith.constant 9.99999974E-6 : f32
      %41 = vector.broadcast %cst_33 : f32 to vector<1x256xf32>
      %42 = arith.addf %38, %41 : vector<1x256xf32>
      %43 = math.rsqrt %42 : vector<1x256xf32>
      %44 = vector.broadcast %43 : vector<1x256xf32> to vector<8x256xf32>
      %45 = arith.mulf %40, %44 : vector<8x256xf32>
      %c0_34 = arith.constant 0 : index
      %c0_35 = arith.constant 0 : index
      %46 = vector.load %arg5[%c0_34, %c0_35] : memref<3x256xf32, #tpu.memory_space<vmem>>, vector<1x256xf32>
      %47 = vector.broadcast %46 : vector<1x256xf32> to vector<8x256xf32>
      %48 = arith.mulf %45, %47 : vector<8x256xf32>
      %c0_36 = arith.constant 0 : index
      %c0_37 = arith.constant 0 : index
      %49 = vector.load %arg6[%c0_36, %c0_37] : memref<3x256xf32, #tpu.memory_space<vmem>>, vector<1x256xf32>
      %50 = vector.broadcast %49 : vector<1x256xf32> to vector<8x256xf32>
      %51 = arith.addf %48, %50 : vector<8x256xf32>
      %c0_38 = arith.constant 0 : index
      %c0_39 = arith.constant 0 : index
      %52 = vector.load %arg10[%c0_38, %c0_39] : memref<8x256xf32, #tpu.memory_space<vmem>>, vector<8x256xf32>
      tpu.vector_store %arg10[%c0_38, %c0_39], %51 {strides = array<i32>} : memref<8x256xf32, #tpu.memory_space<vmem>>, vector<8x256xf32>,
      %53 = arith.truncf %51 : vector<8x256xf32> to vector<8x256xbf16>
      %c0_40 = arith.constant 0 : index
      %c0_41 = arith.constant 0 : index
      %54 = vector.load %arg13[%c0_40, %c0_41] : memref<8x256xbf16, #tpu.memory_space<vmem>>, vector<8x256xbf16>
      tpu.vector_store %arg13[%c0_40, %c0_41], %53 {strides = array<i32>} : memref<8x256xbf16, #tpu.memory_space<vmem>>, vector<8x256xbf16>,
      %c0_42 = arith.constant 0 : index
      %c0_43 = arith.constant 0 : index
      %55 = vector.load %arg8[%c0_42, %c0_43] : memref<8x256xf32, #tpu.memory_space<vmem>>, vector<8x256xf32>
      %cst_44 = arith.constant 1.562500e-02 : f32
      %56 = vector.broadcast %cst_44 : f32 to vector<8x256xf32>
      %57 = arith.mulf %55, %56 : vector<8x256xf32>
      %c0_45 = arith.constant 0 : index
      %c0_46 = arith.constant 0 : index
      %58 = vector.load %arg8[%c0_45, %c0_46] : memref<8x256xf32, #tpu.memory_space<vmem>>, vector<8x256xf32>
      tpu.vector_store %arg8[%c0_45, %c0_46], %57 {strides = array<i32>} : memref<8x256xf32, #tpu.memory_space<vmem>>, vector<8x256xf32>,
      %cst_47 = arith.constant dense<0.000000e+00> : vector<256xf32>
      %59 = vector.multi_reduction <add>, %57, %cst_47 [0] : vector<8x256xf32> to vector<256xf32>
      %60 = vector.shape_cast %59 : vector<256xf32> to vector<1x256xf32>
      %cst_48 = arith.constant 8.000000e+00 : f32
      %61 = vector.broadcast %cst_48 : f32 to vector<1x256xf32>
      %62 = arith.divf %60, %61 : vector<1x256xf32>
      %63 = vector.broadcast %62 : vector<1x256xf32> to vector<8x256xf32>
      %64 = arith.subf %57, %63 : vector<8x256xf32>
      %65 = arith.mulf %64, %64 : vector<8x256xf32>
      %cst_49 = arith.constant dense<0.000000e+00> : vector<256xf32>
      %66 = vector.multi_reduction <add>, %65, %cst_49 [0] : vector<8x256xf32> to vector<256xf32>
      %67 = vector.shape_cast %66 : vector<256xf32> to vector<1x256xf32>
      %cst_50 = arith.constant 8.000000e+00 : f32
      %68 = vector.broadcast %cst_50 : f32 to vector<1x256xf32>
      %69 = arith.divf %67, %68 : vector<1x256xf32>
      %70 = vector.broadcast %62 : vector<1x256xf32> to vector<8x256xf32>
      %71 = arith.subf %57, %70 : vector<8x256xf32>
      %cst_51 = arith.constant 9.99999974E-6 : f32
      %72 = vector.broadcast %cst_51 : f32 to vector<1x256xf32>
      %73 = arith.addf %69, %72 : vector<1x256xf32>
      %74 = math.rsqrt %73 : vector<1x256xf32>
      %75 = vector.broadcast %74 : vector<1x256xf32> to vector<8x256xf32>
      %76 = arith.mulf %71, %75 : vector<8x256xf32>
      %c1 = arith.constant 1 : index
      %c0_52 = arith.constant 0 : index
      %77 = vector.load %arg5[%c1, %c0_52] : memref<3x256xf32, #tpu.memory_space<vmem>>, vector<1x256xf32>
      %78 = vector.broadcast %77 : vector<1x256xf32> to vector<8x256xf32>
      %79 = arith.mulf %76, %78 : vector<8x256xf32>
      %c1_53 = arith.constant 1 : index
      %c0_54 = arith.constant 0 : index
      %80 = vector.load %arg6[%c1_53, %c0_54] : memref<3x256xf32, #tpu.memory_space<vmem>>, vector<1x256xf32>
      %81 = vector.broadcast %80 : vector<1x256xf32> to vector<8x256xf32>
      %82 = arith.addf %79, %81 : vector<8x256xf32>
      %c0_55 = arith.constant 0 : index
      %c0_56 = arith.constant 0 : index
      %83 = vector.load %arg11[%c0_55, %c0_56] : memref<8x256xf32, #tpu.memory_space<vmem>>, vector<8x256xf32>
      tpu.vector_store %arg11[%c0_55, %c0_56], %82 {strides = array<i32>} : memref<8x256xf32, #tpu.memory_space<vmem>>, vector<8x256xf32>,
      %84 = arith.truncf %82 : vector<8x256xf32> to vector<8x256xbf16>
      %c0_57 = arith.constant 0 : index
      %c0_58 = arith.constant 0 : index
      %85 = vector.load %arg14[%c0_57, %c0_58] : memref<8x256xbf16, #tpu.memory_space<vmem>>, vector<8x256xbf16>
      tpu.vector_store %arg14[%c0_57, %c0_58], %84 {strides = array<i32>} : memref<8x256xbf16, #tpu.memory_space<vmem>>, vector<8x256xbf16>,
      %c0_59 = arith.constant 0 : index
      %c0_60 = arith.constant 0 : index
      %86 = vector.load %arg9[%c0_59, %c0_60] : memref<8x256xf32, #tpu.memory_space<vmem>>, vector<8x256xf32>
      %cst_61 = arith.constant 1.562500e-02 : f32
      %87 = vector.broadcast %cst_61 : f32 to vector<8x256xf32>
      %88 = arith.mulf %86, %87 : vector<8x256xf32>
      %c0_62 = arith.constant 0 : index
      %c0_63 = arith.constant 0 : index
      %89 = vector.load %arg9[%c0_62, %c0_63] : memref<8x256xf32, #tpu.memory_space<vmem>>, vector<8x256xf32>
      tpu.vector_store %arg9[%c0_62, %c0_63], %88 {strides = array<i32>} : memref<8x256xf32, #tpu.memory_space<vmem>>, vector<8x256xf32>,
      %cst_64 = arith.constant dense<0.000000e+00> : vector<256xf32>
      %90 = vector.multi_reduction <add>, %88, %cst_64 [0] : vector<8x256xf32> to vector<256xf32>
      %91 = vector.shape_cast %90 : vector<256xf32> to vector<1x256xf32>
      %cst_65 = arith.constant 8.000000e+00 : f32
      %92 = vector.broadcast %cst_65 : f32 to vector<1x256xf32>
      %93 = arith.divf %91, %92 : vector<1x256xf32>
      %94 = vector.broadcast %93 : vector<1x256xf32> to vector<8x256xf32>
      %95 = arith.subf %88, %94 : vector<8x256xf32>
      %96 = arith.mulf %95, %95 : vector<8x256xf32>
      %cst_66 = arith.constant dense<0.000000e+00> : vector<256xf32>
      %97 = vector.multi_reduction <add>, %96, %cst_66 [0] : vector<8x256xf32> to vector<256xf32>
      %98 = vector.shape_cast %97 : vector<256xf32> to vector<1x256xf32>
      %cst_67 = arith.constant 8.000000e+00 : f32
      %99 = vector.broadcast %cst_67 : f32 to vector<1x256xf32>
      %100 = arith.divf %98, %99 : vector<1x256xf32>
      %101 = vector.broadcast %93 : vector<1x256xf32> to vector<8x256xf32>
      %102 = arith.subf %88, %101 : vector<8x256xf32>
      %cst_68 = arith.constant 9.99999974E-6 : f32
      %103 = vector.broadcast %cst_68 : f32 to vector<1x256xf32>
      %104 = arith.addf %100, %103 : vector<1x256xf32>
      %105 = math.rsqrt %104 : vector<1x256xf32>
      %106 = vector.broadcast %105 : vector<1x256xf32> to vector<8x256xf32>
      %107 = arith.mulf %102, %106 : vector<8x256xf32>
      %c2 = arith.constant 2 : index
      %c0_69 = arith.constant 0 : index
      %108 = vector.load %arg5[%c2, %c0_69] : memref<3x256xf32, #tpu.memory_space<vmem>>, vector<1x256xf32>
      %109 = vector.broadcast %108 : vector<1x256xf32> to vector<8x256xf32>
      %110 = arith.mulf %107, %109 : vector<8x256xf32>
      %c2_70 = arith.constant 2 : index
      %c0_71 = arith.constant 0 : index
      %111 = vector.load %arg6[%c2_70, %c0_71] : memref<3x256xf32, #tpu.memory_space<vmem>>, vector<1x256xf32>
      %112 = vector.broadcast %111 : vector<1x256xf32> to vector<8x256xf32>
      %113 = arith.addf %110, %112 : vector<8x256xf32>
      %c0_72 = arith.constant 0 : index
      %c0_73 = arith.constant 0 : index
      %114 = vector.load %arg12[%c0_72, %c0_73] : memref<8x256xf32, #tpu.memory_space<vmem>>, vector<8x256xf32>
      tpu.vector_store %arg12[%c0_72, %c0_73], %113 {strides = array<i32>} : memref<8x256xf32, #tpu.memory_space<vmem>>, vector<8x256xf32>,
      %115 = arith.truncf %113 : vector<8x256xf32> to vector<8x256xbf16>
      %c0_74 = arith.constant 0 : index
      %c0_75 = arith.constant 0 : index
      %116 = vector.load %arg15[%c0_74, %c0_75] : memref<8x256xbf16, #tpu.memory_space<vmem>>, vector<8x256xbf16>
      tpu.vector_store %arg15[%c0_74, %c0_75], %115 {strides = array<i32>} : memref<8x256xbf16, #tpu.memory_space<vmem>>, vector<8x256xbf16>,
    } else {
    }
    return
  }
  func.func @transform_0(%arg0: i32, %arg1: i32) -> (i32, i32, i32) {
    %c0_i32 = arith.constant 0 : i32
    %c0_i32_0 = arith.constant 0 : i32
    return %c0_i32, %arg1, %arg0 : i32, i32, i32
  }
  func.func @transform_1(%arg0: i32, %arg1: i32) -> (i32, i32, i32) {
    %c0_i32 = arith.constant 0 : i32
    %c0_i32_0 = arith.constant 0 : i32
    return %c0_i32, %arg1, %arg0 : i32, i32, i32
  }
  func.func @transform_2(%arg0: i32, %arg1: i32) -> (i32, i32, i32) {
    %c0_i32 = arith.constant 0 : i32
    %c0_i32_0 = arith.constant 0 : i32
    return %c0_i32, %arg1, %arg0 : i32, i32, i32
  }
  func.func @transform_3(%arg0: i32, %arg1: i32) -> (i32, i32) {
    %c0_i32 = arith.constant 0 : i32
    %c0_i32_0 = arith.constant 0 : i32
    return %c0_i32, %arg0 : i32, i32
  }
  func.func @transform_4(%arg0: i32, %arg1: i32) -> (i32, i32) {
    %c0_i32 = arith.constant 0 : i32
    %c0_i32_0 = arith.constant 0 : i32
    return %c0_i32, %arg0 : i32, i32
  }
  func.func @transform_5(%arg0: i32, %arg1: i32) -> (i32, i32) {
    %c0_i32 = arith.constant 0 : i32
    %c0_i32_0 = arith.constant 0 : i32
    return %c0_i32, %arg0 : i32, i32
  }
  func.func @transform_6(%arg0: i32, %arg1: i32) -> (i32, i32) {
    %c0_i32 = arith.constant 0 : i32
    %c0_i32_0 = arith.constant 0 : i32
    return %c0_i32, %arg0 : i32, i32
  }
  func.func @transform_7(%arg0: i32, %arg1: i32) -> (i32, i32) {
    %c0_i32 = arith.constant 0 : i32
    %c0_i32_0 = arith.constant 0 : i32
    return %c0_i32, %arg0 : i32, i32
  }
  func.func @transform_8(%arg0: i32, %arg1: i32) -> (i32, i32) {
    %c0_i32 = arith.constant 0 : i32
    %c0_i32_0 = arith.constant 0 : i32
    return %c0_i32, %arg0 : i32, i32
  }
  func.func @transform_9(%arg0: i32, %arg1: i32) -> (i32, i32) {
    %c0_i32 = arith.constant 0 : i32
    %c0_i32_0 = arith.constant 0 : i32
    return %c0_i32, %arg0 : i32, i32
  }
  func.func @transform_10(%arg0: i32, %arg1: i32) -> (i32, i32) {
    %c0_i32 = arith.constant 0 : i32
    %c0_i32_0 = arith.constant 0 : i32
    return %c0_i32, %arg0 : i32, i32
  }
  func.func @transform_11(%arg0: i32, %arg1: i32) -> (i32, i32) {
    %c0_i32 = arith.constant 0 : i32
    %c0_i32_0 = arith.constant 0 : i32
    return %c0_i32, %arg0 : i32, i32
  }
  func.func @transform_12(%arg0: i32, %arg1: i32) -> (i32, i32) {
    %c0_i32 = arith.constant 0 : i32
    %c0_i32_0 = arith.constant 0 : i32
    return %c0_i32, %arg0 : i32, i32
  }
  func.func @transform_13(%arg0: i32, %arg1: i32) -> (i32, i32) {
    %c0_i32 = arith.constant 0 : i32
    %c0_i32_0 = arith.constant 0 : i32
    return %c0_i32, %arg0 : i32, i32
  }
}

</mosaic_0001>

<bundles_post_ra>
// kernel: tpu_custom_call.1
= control target key start
LH: loop header
LB: loop body
LE: loop exit
PB: predicated region body
PF: predicated region fallthrough
CT: control target
= control target key end

     0   :  { %s3393_s0 = inlined_call_operand.hbm [shape: bf16[8,64,256], index: 0, kind: input, shape index: {}]   ;;  %s3394_s1 = inlined_call_operand.hbm [shape: bf16[8,64,256], index: 1, kind: input, shape index: {}]   ;;  %s3395_s2 = inlined_call_operand.hbm [shape: bf16[8,64,256], index: 2, kind: input, shape index: {}]   ;;  %s3396_s3 = inlined_call_operand.vmem [shape: f32[3,256], index: 3, kind: input, shape index: {}]   ;;  %s3397_s4 = inlined_call_operand.hbm [shape: f32[3,256], index: 4, kind: input, shape index: {}]   ;;  %s3398_s5 = inlined_call_operand.hbm [shape: f32[8,256], index: 5, kind: output, shape index: {0}]   ;;  %s3399_s6 = inlined_call_operand.hbm [shape: f32[8,256], index: 6, kind: output, shape index: {1}]   ;;  %s3400_s7 = inlined_call_operand.hbm [shape: f32[8,256], index: 7, kind: output, shape index: {2}]   ;;  %s3401_s8 = inlined_call_operand.hbm [shape: f32[8,256], index: 8, kind: output, shape index: {3}]   ;;  %s3402_s9 = inlined_call_operand.hbm [shape: f32[8,256], index: 9, kind: output, shape index: {4}]   ;;  %s3403_s10 = inlined_call_operand.hbm [shape: f32[8,256], index: 10, kind: output, shape index: {5}]   ;;  %s3404_s11 = inlined_call_operand.hbm [shape: bf16[8,256], index: 11, kind: output, shape index: {6}]   ;;  %s3405_s12 = inlined_call_operand.hbm [shape: bf16[8,256], index: 12, kind: output, shape index: {7}]   ;;  %s3406_s13 = inlined_call_operand.hbm [shape: bf16[8,256], index: 13, kind: output, shape index: {8}]  }
   0x1   :  { %3417 = sst [smem:[#allocation44_spill]] %s3393_s0 }
   0x2   :  { %3418 = sst [smem:[#allocation45_spill]] %s3397_s4 }
   0x3   :  { %3419 = sst [smem:[#allocation46_spill]] %s3402_s9 }
   0x4   :  { %3420 = sst [smem:[#allocation47_spill]] %s3404_s11 }
   0x5   :  { %3421 = sst [smem:[#allocation48_spill]] %s3406_s13 }
   0x6   :  { %19 = vsyncpa [#allocation3], 0 }
   0x7   :  { %21 = vsyncpa [#allocation3 + $0x1], 0 }
   0x8   :  { %22 = vsyncpa [#allocation6], 0 }
   0x9   :  { %24 = vsyncpa [#allocation6 + $0x1], 0 }
   0xa   :  { %25 = vsyncpa [#allocation9], 0 }
   0xb   :  { %26 = vsyncpa [#allocation4], 0 }
   0xc   :  { %27 = vsyncpa [#allocation12], 0 }
   0xd   :  { %28 = vsyncpa [#allocation15], 0 }
   0xe   :  { %29 = vsyncpa [#allocation18], 0 }
   0xf   :  { %30 = vsyncpa [#allocation21], 0  ;;  %s2627_s25 = smov 0   ;;  %s2629_s26 = smov 0  }
  0x10   :  { %s2631_s27 = smov 0   ;;  %s2633_s28 = smov 0  }
  0x11   :  { %s2635_s29 = smov 0   ;;  %s2637_s30 = smov 0  }
  0x12 LB: > { %3422 = sst [smem:[#allocation40_spill]] %s2514_s27  ;;  %s2656_s14 = sadd.s32 4294967295, %s2526_s30   ;;  %s2526_s30 = sphi %s2637_s30, %s36_s30   ;;  %s2522_s29 = sphi %s2635_s29, %s3443_s29   ;;  %s2518_s28 = sphi %s2633_s28, %s3442_s28   ;;  %s2514_s27 = sphi %s2631_s27, %s3441_s27   ;;  %s2510_s26 = sphi %s2629_s26, %s3445_s26   ;;  %s2506_s25 = sphi %s2627_s25, %s3444_s25  }
  0x13   : > { %3423 = sst [smem:[#allocation41_spill]] %s2522_s29  ;;  %s45_s15 = sadd.s32 1, %s2522_s29 }
  0x14   : > { %p46_p0 = scmp.ge.s32.totalorder %s45_s15, 4  ;;  %s57_s16 = sadd.s32 1, %s2514_s27 }
  0x15   : > { %p64_p1 = scmp.ne.s32.totalorder %s2514_s27, %s2510_s26  ;;  %p65_p2 = scmp.eq.s32.totalorder %s2526_s30, 0 }
  0x16   : > { %s3447_s15 = smov (%p46_p0, %s45_s15), 0  ;;  %p70_p4 = scmp.ne.s32.totalorder %s2510_s26, %s2506_s25 }
  0x17   : > { %3424 = sst [smem:[#allocation42_spill]] %s3447_s15  ;;  %p2665_p3 = por %p65_p2, %p64_p1 }
  0x18   : > { %s52_s18 = ssub.s32 %s2522_s29, %s3447_s15  ;;  %p3410_p5 = scmp.eq.s32.totalorder %s2656_s14, 0 }
  0x19   : > { %s3425_s17 = scalar_select %p2665_p3, 1, 0 }
  0x1a   : > { %p55_p6 = scmp.eq.s32.totalorder %s52_s18, 0  ;;  %p1943_p7 = scmp.ge.s32.totalorder %s2526_s30, 1 }
  0x1b   : > { %p2676_p8 = por %p3410_p5, %p70_p4  ;;  %p423_p9 = scmp.lt.s32.totalorder %s2526_s30, 5 }
  0x1c   : > { %s2682_s20 = scalar_select %p55_p6, %s2514_s27, %s57_s16  }
  0x1d   : > { %s3426_s19 = scalar_select %p2676_p8, 1, 0 }
  0x1e   : > { %3427 = sst [smem:[#allocation43_spill]] %s2682_s20  ;;  %p2684_p10 = pnand %p1943_p7, %p423_p9 }
  0x1f   : > { %s2528_s22 = smov [#allocation8]   ;;  %s3430_s4 = sld [smem:[#allocation45_spill]] }
  0x20   : > { %s3428_s21 = scalar_select %p2684_p10, 1, 0 }
  0x21   : > { %p2073_p11 = pneg %p2684_p10  ;;  %s448_s23 = sshll.u32 %s2528_s22, 4  ;;  %s449_s23 = int_to_ptr.vmem [resolvable:$true] %s448_s23 }
  0x23   : > { %p2692_p12 = pnand %p2073_p11, %p3410_p5 }
  0x25   : > { %s2186_s16 = scalar_lea.hbm %s3430_s4, 128  ;;  %p2188_p0 = pneg %p2692_p12 }
  0x26   : > { %p2187_p13 = scmp.ne.s32.totalorder %s3430_s4, %s2186_s16  ;;  %p2193_p4 = scmp.lt.u32.totalorder %s2186_s16, %s3430_s4 }
  0x28   : > { %p2189_p1 = pnand %p2188_p0, %p2187_p13 }
  0x2a   : > { %p2190_p2 = pneg %p2189_p1 }
  0x2c   : > { %p2195_p6 = pnand %p2193_p4, %p2190_p2 }
  0x2e   : > { %2198 = shalt.err (!%p2195_p6)
}
  0x2f   : > { %s2199_s11 = scalar_lea.vmem %s449_s23, 128  ;;  %p2207_p5 = scmp.lt.s32.totalorder %s449_s23, %s449_s23 }
  0x30   : > { %p2200_p7 = scmp.ne.s32.totalorder %s449_s23, %s2199_s11  ;;  %p2208_p8 = scmp.lt.s32.totalorder %s2199_s11, %s2199_s11 }
  0x32   : > { %p2202_p9 = pnand %p2200_p7, %p2188_p0  ;;  %p2209_p10 = por %p2208_p8, %p2207_p5 }
  0x34   : > { %p2203_p11 = pneg %p2202_p9 }
  0x36   : > { %p2210_p3 = pnand %p2209_p10, %p2203_p11 }
  0x38   : > { %2213 = shalt.err (!%p2210_p3)
}
  0x39   : > { %2076 = dma.hbm_to_vmem [thread:$0]  (!%p2692_p12), %s3430_s4, 128, %s449_s23, [#allocation9]  }
  0x3a   : > { %p1946_p13 = scmp.ge.s32.totalorder %s2526_s30, 4 }
  0x3c   : > { %455 = sbr.rel (%p1946_p13) target bundleno = 106 (0x6a), region = 24 }
  0x43   : > { %s459_s13 = sand.u32 1, %s2514_s27   ;;  %s2715_s11 = sshll.u32 %s2522_s29, 8 }
  0x44   : > { %s2717_s24 = sshll.u32 %s459_s13, 7  ;;  %s3431_s0 = sld [smem:[#allocation44_spill]] }
  0x45   : > { %p3432_p3 = scmp.ne.s32.totalorder %s3425_s17, 0  ;;  %s463_s22 = scalar_lea.vmem [#allocation2], %s2717_s24 }
  0x46   : > { %s485_s15 = sshll.u32 %s463_s22, 4  ;;  %s2529_s4 = smov 1024   ;;  %s486_s15 = int_to_ptr.vmem [resolvable:$true] %s485_s15 }
  0x47   : > { %s2008_s16 = scalar_select %p3432_p3, [#allocation0], [#allocation29] }
  0x48   : > { %2009 = sst [smem:[#allocation24]] (%p3432_p3), %s2529_s4  ;;  %s2530_s29 = smov 256  }
  0x49   : > { %s477_s20 = sld [smem:[%s2008_s16]]   ;;  %s2531_s27 = smov 2  }
  0x4a   : > { %s472_s23 = scalar_lea.hbm %s3431_s0, %s2715_s11  ;;  %2010 = sst [smem:[#allocation24 + $0x1]] (%p3432_p3), %s2530_s29 }
  0x4b   : > { %2011 = sst [smem:[#allocation24 + $0x2]] (%p3432_p3), %s2531_s27  ;;  %s2532_s25 = smov 128  }
  0x4c   : > { %2012 = sst [smem:[#allocation24 + $0x3]] (%p3432_p3), %s2532_s25  ;;  %s2533_s0 = smov 8  }
  0x4d   : > { %2013 = sst [smem:[#allocation24 + $0x4]] (%p3432_p3), %s2532_s25  ;;  %s460_s22 = scalar_lea.sflag [#allocation3], %s459_s13 }
  0x4e   : > { %2014 = sst [smem:[#allocation24 + $0x5]] (%p3432_p3), %s2533_s0  ;;  %s2534_s9 = smov [#allocation23]  }
  0x4f   : > { %s1951_s18 = sshll.u32 %s477_s20, 26 }
  0x50   : > { %s1952_s16 = sadd.s32 134217728, %s1951_s18 }
  0x51   : > { %2015 = dma.general (%p3432_p3), %s472_s23, 2048, %s486_s15, %s460_s22, %s2534_s9, [#allocation24], %s1952_s16, 0  }
  0x52   : > { %s508_s4 = sand.u32 1, %s2526_s30   ;;  %s521_s20 = scalar_lea.hbm %s3394_s1, %s2715_s11 }
  0x53   : > { %s2016_s0 = scalar_select %p3432_p3, [#allocation0], [#allocation30] }
  0x54   : > { %s512_s13 = scalar_lea.vmem [#allocation5], %s2717_s24  ;;  %s2535_s23 = smov 1024  }
  0x55   : > { %s534_s25 = sshll.u32 %s512_s13, 4  ;;  %s526_s9 = sld [smem:[%s2016_s0]]   ;;  %s535_s25 = int_to_ptr.vmem [resolvable:$true] %s534_s25 }
  0x56   : > { %2017 = sst [smem:[#allocation26]] (%p3432_p3), %s2535_s23  ;;  %s2536_s15 = smov 256  }
  0x57   : > { %2018 = sst [smem:[#allocation26 + $0x1]] (%p3432_p3), %s2536_s15  ;;  %s2537_s18 = smov 2  }
  0x58   : > { %2019 = sst [smem:[#allocation26 + $0x2]] (%p3432_p3), %s2537_s18  ;;  %s2538_s16 = smov 128  }
  0x59   : > { %2020 = sst [smem:[#allocation26 + $0x3]] (%p3432_p3), %s2538_s16  ;;  %s2539_s27 = smov 8  }
  0x5a   : > { %2021 = sst [smem:[#allocation26 + $0x4]] (%p3432_p3), %s2538_s16  ;;  %s509_s0 = scalar_lea.sflag [#allocation6], %s508_s4 }
  0x5b   : > { %s1957_s22 = sshll.u32 %s526_s9, 26  ;;  %2022 = sst [smem:[#allocation26 + $0x5]] (%p3432_p3), %s2539_s27 }
  0x5c   : > { %s1958_s29 = sadd.s32 134217728, %s1957_s22  ;;  %s2540_s13 = smov [#allocation25]  }
  0x5d   : > { %2023 = dma.general (%p3432_p3), %s521_s20, 2048, %s535_s25, %s509_s0, %s2540_s13, [#allocation26], %s1958_s29, 0  }
  0x5e   : > { %s570_s9 = scalar_lea.hbm %s3395_s2, %s2715_s11  ;;  %s561_s16 = scalar_lea.vmem [#allocation7], %s2717_s24 }
  0x5f   : > { %s2024_s18 = scalar_select %p3432_p3, [#allocation0], [#allocation31] }
  0x60   : > { %s583_s4 = sshll.u32 %s561_s16, 4  ;;  %s2541_s20 = smov 1024   ;;  %s584_s4 = int_to_ptr.vmem [resolvable:$true] %s583_s4 }
  0x61   : > { %s575_s22 = sld [smem:[%s2024_s18]]   ;;  %s2542_s25 = smov 256  }
  0x62   : > { %2025 = sst [smem:[#allocation28]] (%p3432_p3), %s2541_s20  ;;  %s2543_s27 = smov 2  }
  0x63   : > { %2026 = sst [smem:[#allocation28 + $0x1]] (%p3432_p3), %s2542_s25  ;;  %s2544_s29 = smov 128  }
  0x64   : > { %2027 = sst [smem:[#allocation28 + $0x2]] (%p3432_p3), %s2543_s27  ;;  %s2545_s24 = smov 8  }
  0x65   : > { %2028 = sst [smem:[#allocation28 + $0x3]] (%p3432_p3), %s2544_s29  ;;  %s2546_s23 = smov [#allocation27]  }
  0x66   : > { %2029 = sst [smem:[#allocation28 + $0x4]] (%p3432_p3), %s2544_s29 }
  0x67   : > { %s1963_s11 = sshll.u32 %s575_s22, 26  ;;  %2030 = sst [smem:[#allocation28 + $0x5]] (%p3432_p3), %s2545_s24 }
  0x68   : > { %s1964_s13 = sadd.s32 134217728, %s1963_s11 }
  0x69   : > { %2031 = dma.general (%p3432_p3), %s570_s9, 2048, %s584_s4, %s509_s0, %s2546_s23, [#allocation28], %s1964_s13, 0  }
  0x6a PF: > { %p3433_p5 = scmp.ne.s32.totalorder %s3428_s21, 0 }
  0x6b   : > { %s610_s15 = sand.u32 (!%p3433_p5), 1, %s2510_s26   ;;  %p3434_p8 = scmp.ne.s32.totalorder (!%p3433_p5), %s3426_s19, 0 }
  0x6c   : > { %608 = sbr.rel (%p3433_p5) target bundleno = 549 (0x225), region = 40  ;;  %s1966_s18 = sshll.u32 (!%p3433_p5), %s610_s15, 7 }
  0x6d   : > { %s611_s16 = scalar_lea.sflag (!%p3433_p5), [#allocation3], %s610_s15  ;;  %s2786_s20 = scalar_lea.vmem (!%p3433_p5), [#allocation2], %s1966_s18 }
  0x73   : > { %2473 = dma.done.wait (%p3434_p8), %s611_s16, 2048  }
  0x74   : > { %2475 = vsyncadd (%p3434_p8), %s611_s16, 4294965248  ;;  %s619_s17 = sand.u32 1, %s2656_s14   ;;  %s2793_s9 = scalar_lea.vmem [#allocation5], %s1966_s18 }
  0x75   : > { %s620_s0 = scalar_lea.sflag [#allocation6], %s619_s17 }
  0x76   : > { %2477 = dma.done.wait (%p3434_p8), %s620_s0, 4096  }
  0x77   : > { %2479 = vsyncadd (%p3434_p8), %s620_s0, 4294963200  ;;  %s2799_s21 = scalar_lea.vmem [#allocation7], %s1966_s18  ;;  %p3435_p10 = scmp.eq.s32.totalorder %s2656_s14, 0 }
  0x79   : > { %2481 = dma.done.wait (%p3435_p10), [#allocation9], 128   ;;  %p3436_p12 = pmov %p3435_p10 }
  0x7a   : > { %p1970_p0 = scmp.ne.s32.totalorder %s2518_s28, 0 }
  0x7b   : > { %2483 = vsyncadd (%p3436_p12), [#allocation9], 4294967168  ;;  %v2547_v0 = vmov (!%p1970_p0), 0.0  }
  0x7c   : > { %714 = sbr.rel (%p1970_p0) target bundleno = 131 (0x83), region = 60  ;;  %715 = vst [vmem:[#allocation10] sm:$0xff] (!%p1970_p0), %v2547_v0  ;;  %716 = vst [vmem:[#allocation10 + $0x8] sm:$0xff] (!%p1970_p0), %v2547_v0 }
  0x7d   : > { %717 = vst [vmem:[#allocation11] sm:$0xff] (!%p1970_p0), %v2547_v0  ;;  %718 = vst [vmem:[#allocation11 + $0x8] sm:$0xff] (!%p1970_p0), %v2547_v0 }
  0x7e   : > { %719 = vst [vmem:[#allocation13] sm:$0xff] (!%p1970_p0), %v2547_v0  ;;  %720 = vst [vmem:[#allocation13 + $0x8] sm:$0xff] (!%p1970_p0), %v2547_v0 }
  0x83 PF: > { %v723_v1 = vld [vmem:[%s2786_s20] sm:$0xff]  ;;  %v724_v2 = vld [vmem:[%s2786_s20 + $0x8] sm:$0xff]  ;;  %v725_v3 = vld [vmem:[%s2786_s20 + $0x10] sm:$0xff]  ;;  %vm899_vm0 = vcmask 1041409   ;;  %vm901_vm1 = vcmask 1042434   ;;  %vm903_vm2 = vcmask 1043459  }
  0x84   : > { %v726_v4 = vld [vmem:[%s2786_s20 + $0x18] sm:$0xff]  ;;  %v727_v5 = vld [vmem:[%s2786_s20 + $0x20] sm:$0xff]  ;;  %v728_v6 = vld [vmem:[%s2786_s20 + $0x28] sm:$0xff]  ;;  %v739_v8 = vunpack.c.l.bf16 %v723_v1  ;;  %v740_v9 = vunpack.c.h.bf16 %v723_v1  ;;  %v741_v10 = vunpack.c.l.bf16 %v724_v2  ;;  %v742_v11 = vunpack.c.h.bf16 %v724_v2  ;;  %p1971_p1 = scmp.ne.s32.totalorder %s2518_s28, 3 }
  0x85   : > { %v729_v7 = vld [vmem:[%s2786_s20 + $0x30] sm:$0xff]  ;;  %v730_v12 = vld [vmem:[%s2786_s20 + $0x38] sm:$0xff]  ;;  %v2815_v13 = vld [vmem:[%s2786_s20 + $0x40] sm:$0xff]  ;;  %v743_v15 = vunpack.c.l.bf16 %v725_v3  ;;  %v744_v16 = vunpack.c.h.bf16 %v725_v3  ;;  %v745_v17 = vunpack.c.l.bf16 %v726_v4  ;;  %v746_v18 = vunpack.c.h.bf16 %v726_v4 }
  0x86   : > { %v2818_v14 = vld [vmem:[%s2786_s20 + $0x48] sm:$0xff]  ;;  %v2821_v19 = vld [vmem:[%s2786_s20 + $0x50] sm:$0xff]  ;;  %v2824_v20 = vld [vmem:[%s2786_s20 + $0x58] sm:$0xff]  ;;  %v747_v21 = vunpack.c.l.bf16 %v727_v5  ;;  %v748_v22 = vunpack.c.h.bf16 %v727_v5  ;;  %v749_v23 = vunpack.c.l.bf16 %v728_v6  ;;  %v750_v24 = vunpack.c.h.bf16 %v728_v6 }
  0x87   : > { %v2827_v25 = vld [vmem:[%s2786_s20 + $0x60] sm:$0xff]  ;;  %v2830_v26 = vld [vmem:[%s2786_s20 + $0x68] sm:$0xff]  ;;  %v751_v27 = vunpack.c.l.bf16 %v729_v7  ;;  %v752_v28 = vunpack.c.h.bf16 %v729_v7  ;;  %v753_v29 = vunpack.c.l.bf16 %v730_v12  ;;  %v754_v30 = vunpack.c.h.bf16 %v730_v12  ;;  %v2833_v31 = vld [vmem:[%s2786_s20 + $0x70] sm:$0xff] }
  0x88   : > { %v755_v32 = vunpack.c.l.bf16 %v2815_v13  ;;  %v756_v33 = vunpack.c.h.bf16 %v2815_v13  ;;  %v757_v34 = vunpack.c.l.bf16 %v2818_v14  ;;  %v758_v35 = vunpack.c.h.bf16 %v2818_v14 }
  0x89   : > { %v759_v36 = vunpack.c.l.bf16 %v2821_v19  ;;  %v760_v37 = vunpack.c.h.bf16 %v2821_v19  ;;  %v761_v38 = vunpack.c.l.bf16 %v2824_v20  ;;  %v762_v39 = vunpack.c.h.bf16 %v2824_v20 }
  0x8a   : > { %v763_v40 = vunpack.c.l.bf16 %v2827_v25  ;;  %v764_v41 = vunpack.c.h.bf16 %v2827_v25  ;;  %v765_v42 = vunpack.c.l.bf16 %v2830_v26  ;;  %v766_v43 = vunpack.c.h.bf16 %v2830_v26 }
  0x8b   : > { %v767_v44 = vunpack.c.l.bf16 %v2833_v31  ;;  %v768_v45 = vunpack.c.h.bf16 %v2833_v31  ;;  %v771_v46 = vadd.f32 %v741_v10, %v739_v8  ;;  %v778_v47 = vadd.f32 %v742_v11, %v740_v9 }
  0x8c   : > { %v785_v48 = vadd.f32 %v745_v17, %v743_v15  ;;  %v792_v49 = vadd.f32 %v746_v18, %v744_v16  ;;  %v799_v50 = vadd.f32 %v749_v23, %v747_v21  ;;  %v806_v51 = vadd.f32 %v750_v24, %v748_v22  ;;  %v738_v18 = vld [vmem:[%s2786_s20 + $0x78] sm:$0xff] }
  0x8d   : > { %v772_v52 = vrot.slane %v771_v46, 4  ;;  %v779_v53 = vrot.slane %v778_v47, 4  ;;  %v813_v54 = vadd.f32 %v753_v29, %v751_v27  ;;  %v820_v55 = vadd.f32 %v754_v30, %v752_v28 }
  0x8e   : > { %v786_v56 = vrot.slane %v785_v48, 4  ;;  %v793_v57 = vrot.slane %v792_v49, 4  ;;  %v800_v58 = vrot.slane %v799_v50, 4  ;;  %v807_v59 = vrot.slane %v806_v51, 4 }
  0x8f   : > { %v773_v60 = vadd.f32 %v772_v52, %v771_v46  ;;  %v780_v61 = vadd.f32 %v779_v53, %v778_v47  ;;  %v814_v62 = vrot.slane %v813_v54, 4  ;;  %v821_v63 = vrot.slane %v820_v55, 4 }
  0x90   : > { %v787_v0 = vadd.f32 %v786_v56, %v785_v48  ;;  %v794_v1 = vadd.f32 %v793_v57, %v792_v49  ;;  %v801_v2 = vadd.f32 %v800_v58, %v799_v50  ;;  %v808_v3 = vadd.f32 %v807_v59, %v806_v51 }
  0x91   : > { %v774_v4 = vrot.slane %v773_v60, 2  ;;  %v781_v5 = vrot.slane %v780_v61, 2  ;;  %v815_v6 = vadd.f32 %v814_v62, %v813_v54  ;;  %v822_v7 = vadd.f32 %v821_v63, %v820_v55 }
  0x92   : > { %v788_v8 = vrot.slane %v787_v0, 2  ;;  %v795_v9 = vrot.slane %v794_v1, 2  ;;  %v802_v10 = vrot.slane %v801_v2, 2  ;;  %v809_v11 = vrot.slane %v808_v3, 2 }
  0x93   : > { %v775_v12 = vadd.f32 %v774_v4, %v773_v60  ;;  %v782_v15 = vadd.f32 %v781_v5, %v780_v61  ;;  %v816_v16 = vrot.slane %v815_v6, 2  ;;  %v823_v17 = vrot.slane %v822_v7, 2 }
  0x94   : > { %v789_v21 = vadd.f32 %v788_v8, %v787_v0  ;;  %v796_v22 = vadd.f32 %v795_v9, %v794_v1  ;;  %v803_v23 = vadd.f32 %v802_v10, %v801_v2  ;;  %v810_v24 = vadd.f32 %v809_v11, %v808_v3 }
  0x95   : > { %v776_v27 = vrot.slane %v775_v12, 1  ;;  %v783_v28 = vrot.slane %v782_v15, 1  ;;  %v2850_v29 = vadd.f32 %v816_v16, %v815_v6  ;;  %v2852_v30 = vadd.f32 %v823_v17, %v822_v7 }
  0x96   : > { %v790_v46 = vrot.slane %v789_v21, 1  ;;  %v797_v47 = vrot.slane %v796_v22, 1  ;;  %v804_v48 = vrot.slane %v803_v23, 1  ;;  %v811_v49 = vrot.slane %v810_v24, 1 }
  0x97   : > { %v769_v50 = vunpack.c.l.bf16 %v738_v18  ;;  %v770_v51 = vunpack.c.h.bf16 %v738_v18  ;;  %v2854_v52 = vadd.f32 %v776_v27, %v775_v12  ;;  %v2856_v53 = vadd.f32 %v783_v28, %v782_v15 }
  0x98   : > { %v2858_v54 = vadd.f32 %v790_v46, %v789_v21  ;;  %v2860_v55 = vadd.f32 %v797_v47, %v796_v22  ;;  %v818_v56 = vrot.slane %v2850_v29, 1  ;;  %v825_v57 = vrot.slane %v2852_v30, 1 }
  0x99   : > { %v2864_v58 = vadd.f32 %v804_v48, %v803_v23  ;;  %v2866_v59 = vadd.f32 %v811_v49, %v810_v24  ;;  %v827_v60 = vadd.f32 %v757_v34, %v755_v32  ;;  %v834_v61 = vadd.f32 %v758_v35, %v756_v33 }
  0x9a   : > { %v841_v62 = vadd.f32 %v761_v38, %v759_v36  ;;  %v848_v63 = vadd.f32 %v762_v39, %v760_v37  ;;  %v855_v32 = vadd.f32 %v765_v42, %v763_v40  ;;  %v862_v13 = vadd.f32 %v766_v43, %v764_v41 }
  0x9b   : > { %v828_v14 = vrot.slane %v827_v60, 4  ;;  %v835_v33 = vrot.slane %v834_v61, 4  ;;  %v869_v34 = vadd.f32 %v769_v50, %v767_v44  ;;  %v876_v19 = vadd.f32 %v770_v51, %v768_v45 }
  0x9c   : > { %v842_v20 = vrot.slane %v841_v62, 4  ;;  %v849_v35 = vrot.slane %v848_v63, 4  ;;  %v856_v36 = vrot.slane %v855_v32, 4  ;;  %v863_v37 = vrot.slane %v862_v13, 4 }
  0x9d   : > { %v829_v38 = vadd.f32 %v828_v14, %v827_v60  ;;  %v836_v39 = vadd.f32 %v835_v33, %v834_v61  ;;  %v870_v40 = vrot.slane %v869_v34, 4  ;;  %v877_v25 = vrot.slane %v876_v19, 4  ;;  %v2899_v60 = vld [vmem:[%s2793_s9] sm:$0xff] }
  0x9e   : > { %v843_v26 = vadd.f32 %v842_v20, %v841_v62  ;;  %v850_v41 = vadd.f32 %v849_v35, %v848_v63  ;;  %v857_v42 = vadd.f32 %v856_v36, %v855_v32  ;;  %v864_v43 = vadd.f32 %v863_v37, %v862_v13  ;;  %v2913_v13 = vld [vmem:[%s2793_s9 + $0x10] sm:$0xff]  ;;  %v933_v36 = vld [vmem:[%s2793_s9 + $0x28] sm:$0xff] }
  0x9f   : > { %v830_v0 = vrot.slane %v829_v38, 2  ;;  %v837_v44 = vrot.slane %v836_v39, 2  ;;  %v871_v1 = vadd.f32 %v870_v40, %v869_v34  ;;  %v878_v31 = vadd.f32 %v877_v25, %v876_v19  ;;  %v932_v19 = vld [vmem:[%s2793_s9 + $0x20] sm:$0xff] }
  0xa0   : > { %vm905_vm3 = vcmask 1044484   ;;  %v844_v45 = vrot.slane %v843_v26, 2  ;;  %v851_v2 = vrot.slane %v850_v41, 2  ;;  %v858_v3 = vrot.slane %v857_v42, 2 }
  0xa1   : > { %v865_v4 = vrot.slane %v864_v43, 2  ;;  %vm907_vm4 = vcmask 1045509   ;;  %v831_v5 = vadd.f32 %v830_v0, %v829_v38  ;;  %v838_v6 = vadd.f32 %v837_v44, %v836_v39  ;;  %v722_v39 = vld [vmem:[#allocation10 + $0x8] sm:$0xff]  ;;  %v935_v44 = vld [vmem:[%s2793_s9 + $0x38] sm:$0xff] }
  0xa2   : > { %v872_v7 = vrot.slane %v871_v1, 2  ;;  %v879_v8 = vrot.slane %v878_v31, 2  ;;  %v845_v9 = vadd.f32 %v844_v45, %v843_v26  ;;  %v852_v10 = vadd.f32 %v851_v2, %v850_v41  ;;  %v934_v26 = vld [vmem:[%s2793_s9 + $0x30] sm:$0xff] }
  0xa3   : > { %v859_v11 = vadd.f32 %v858_v3, %v857_v42  ;;  %v866_v12 = vadd.f32 %v865_v4, %v864_v43  ;;  %v832_v15 = vrot.slane %v831_v5, 1  ;;  %v839_v16 = vrot.slane %v838_v6, 1  ;;  %v2942_v4 = vld [vmem:[%s2793_s9 + $0x48] sm:$0xff] }
  0xa4   : > { %v873_v17 = vadd.f32 %v872_v7, %v871_v1  ;;  %v880_v18 = vadd.f32 %v879_v8, %v878_v31  ;;  %v846_v21 = vrot.slane %v845_v9, 1  ;;  %v853_v22 = vrot.slane %v852_v10, 1  ;;  %v2938_v1 = vld [vmem:[%s2793_s9 + $0x40] sm:$0xff] }
  0xa5   : > { %v860_v23 = vrot.slane %v859_v11, 1  ;;  %v867_v24 = vrot.slane %v866_v12, 1  ;;  %v819_v27 = vadd.f32 %v818_v56, %v2850_v29  ;;  %v826_v28 = vadd.f32 %v825_v57, %v2852_v30  ;;  %v2905_v56 = vld [vmem:[%s2793_s9 + $0x8] sm:$0xff] }
  0xa6   : > { %v874_v46 = vrot.slane %v873_v17, 1  ;;  %v881_v47 = vrot.slane %v880_v18, 1  ;;  %v833_v48 = vadd.f32 %v832_v15, %v831_v5  ;;  %v840_v49 = vadd.f32 %v839_v16, %v838_v6  ;;  %v2945_v5 = vld [vmem:[%s2793_s9 + $0x50] sm:$0xff]  ;;  %v2954_v16 = vld [vmem:[%s2793_s9 + $0x68] sm:$0xff] }
  0xa7   : > { %v847_v50 = vadd.f32 %v846_v21, %v845_v9  ;;  %v854_v51 = vadd.f32 %v853_v22, %v852_v10  ;;  %v861_v61 = vadd.f32 %v860_v23, %v859_v11  ;;  %v868_v62 = vadd.f32 %v867_v24, %v866_v12  ;;  %v2948_v9 = vld [vmem:[%s2793_s9 + $0x58] sm:$0xff]  ;;  %v2951_v10 = vld [vmem:[%s2793_s9 + $0x60] sm:$0xff] }
  0xa8   : > { %v875_v63 = vadd.f32 %v874_v46, %v873_v17  ;;  %v900_v29 = vsel %vm899_vm0, %v2858_v54, %v2854_v52  ;;  %v882_v30 = vadd.f32 %v881_v47, %v880_v18  ;;  %vm909_vm5 = vcmask 1046534   ;;  %v931_v54 = vld [vmem:[%s2793_s9 + $0x18] sm:$0xff]  ;;  %v2957_v17 = vld [vmem:[%s2793_s9 + $0x70] sm:$0xff] }
  0xa9   : > { %v902_v57 = vsel %vm901_vm1, %v2864_v58, %v900_v29  ;;  %v913_v32 = vsel %vm899_vm0, %v2860_v55, %v2856_v53  ;;  %vm911_vm6 = vcmask 1047559   ;;  %v944_v33 = vunpack.c.l.bf16 %v2899_v60  ;;  %v721_v55 = vld [vmem:[#allocation10] sm:$0xff] }
  0xaa   : > { %v904_v14 = vsel %vm903_vm2, %v819_v27, %v902_v57  ;;  %v914_v52 = vsel %vm901_vm1, %v2866_v59, %v913_v32  ;;  %v945_v20 = vunpack.c.h.bf16 %v2899_v60  ;;  %v946_v53 = vunpack.c.l.bf16 %v2905_v56 }
  0xab   : > { %v906_v58 = vsel %vm905_vm3, %v833_v48, %v904_v14  ;;  %v915_v34 = vsel %vm903_vm2, %v826_v28, %v914_v52  ;;  %v947_v37 = vunpack.c.h.bf16 %v2905_v56  ;;  %v948_v38 = vunpack.c.l.bf16 %v2913_v13 }
  0xac   : > { %v908_v35 = vsel %vm907_vm4, %v847_v50, %v906_v58  ;;  %v916_v59 = vsel %vm905_vm3, %v840_v49, %v915_v34  ;;  %v949_v41 = vunpack.c.h.bf16 %v2913_v13  ;;  %v950_v42 = vunpack.c.l.bf16 %v931_v54 }
  0xad   : > { %v910_v40 = vsel %vm909_vm5, %v861_v61, %v908_v35  ;;  %v917_v25 = vsel %vm907_vm4, %v854_v51, %v916_v59  ;;  %v951_v31 = vunpack.c.h.bf16 %v931_v54  ;;  %v952_v45 = vunpack.c.l.bf16 %v932_v19 }
  0xae   : > { %v912_v43 = vsel %vm911_vm6, %v875_v63, %v910_v40  ;;  %v918_v0 = vsel %vm909_vm5, %v868_v62, %v917_v25  ;;  %v953_v6 = vunpack.c.h.bf16 %v932_v19  ;;  %v954_v7 = vunpack.c.l.bf16 %v933_v36 }
  0xaf   : > { %v919_v2 = vsel %vm911_vm6, %v882_v30, %v918_v0  ;;  %v922_v3 = vadd.f32 %v912_v43, %v721_v55  ;;  %v955_v11 = vunpack.c.h.bf16 %v933_v36  ;;  %v956_v12 = vunpack.c.l.bf16 %v934_v26 }
  0xb0   : > { %v923_v8 = vadd.f32 %v919_v2, %v722_v39  ;;  %v957_v15 = vunpack.c.h.bf16 %v934_v26  ;;  %v958_v18 = vunpack.c.l.bf16 %v935_v44  ;;  %v959_v21 = vunpack.c.h.bf16 %v935_v44 }
  0xb1   : > { %924 = vst [vmem:[#allocation10] sm:$0xff] %v922_v3  ;;  %v960_v22 = vunpack.c.l.bf16 %v2938_v1  ;;  %v961_v23 = vunpack.c.h.bf16 %v2938_v1  ;;  %v962_v24 = vunpack.c.l.bf16 %v2942_v4  ;;  %v963_v27 = vunpack.c.h.bf16 %v2942_v4 }
  0xb2   : > { %925 = vst [vmem:[#allocation10 + $0x8] sm:$0xff] %v923_v8  ;;  %v964_v28 = vunpack.c.l.bf16 %v2945_v5  ;;  %v965_v46 = vunpack.c.h.bf16 %v2945_v5  ;;  %v966_v47 = vunpack.c.l.bf16 %v2948_v9  ;;  %v967_v48 = vunpack.c.h.bf16 %v2948_v9 }
  0xb3   : > { %v968_v49 = vunpack.c.l.bf16 %v2951_v10  ;;  %v969_v50 = vunpack.c.h.bf16 %v2951_v10  ;;  %v970_v51 = vunpack.c.l.bf16 %v2954_v16  ;;  %v971_v60 = vunpack.c.h.bf16 %v2954_v16 }
  0xb4   : > { %v972_v61 = vunpack.c.l.bf16 %v2957_v17  ;;  %v973_v62 = vunpack.c.h.bf16 %v2957_v17  ;;  %v976_v63 = vadd.f32 %v946_v53, %v944_v33  ;;  %v983_v29 = vadd.f32 %v947_v37, %v945_v20 }
  0xb5   : > { %v990_v56 = vadd.f32 %v950_v42, %v948_v38  ;;  %v997_v30 = vadd.f32 %v951_v31, %v949_v41  ;;  %v1004_v57 = vadd.f32 %v954_v7, %v952_v45  ;;  %v1011_v32 = vadd.f32 %v955_v11, %v953_v6  ;;  %v943_v45 = vld [vmem:[%s2793_s9 + $0x78] sm:$0xff] }
  0xb6   : > { %v1018_v13 = vadd.f32 %v958_v18, %v956_v12  ;;  %v1025_v14 = vadd.f32 %v959_v21, %v957_v15  ;;  %v977_v52 = vrot.slane %v976_v63, 4  ;;  %v984_v54 = vrot.slane %v983_v29, 4 }
  0xb7   : > { %v991_v58 = vrot.slane %v990_v56, 4  ;;  %v998_v34 = vrot.slane %v997_v30, 4  ;;  %v1005_v19 = vrot.slane %v1004_v57, 4  ;;  %v1012_v55 = vrot.slane %v1011_v32, 4 }
  0xb8   : > { %v1019_v35 = vrot.slane %v1018_v13, 4  ;;  %v1026_v59 = vrot.slane %v1025_v14, 4  ;;  %v978_v36 = vadd.f32 %v977_v52, %v976_v63  ;;  %v985_v39 = vadd.f32 %v984_v54, %v983_v29 }
  0xb9   : > { %v992_v40 = vadd.f32 %v991_v58, %v990_v56  ;;  %v999_v33 = vadd.f32 %v998_v34, %v997_v30  ;;  %v1006_v20 = vadd.f32 %v1005_v19, %v1004_v57  ;;  %v1013_v53 = vadd.f32 %v1012_v55, %v1011_v32 }
  0xba   : > { %v1020_v37 = vadd.f32 %v1019_v35, %v1018_v13  ;;  %v1027_v38 = vadd.f32 %v1026_v59, %v1025_v14  ;;  %v979_v25 = vrot.slane %v978_v36, 2  ;;  %v986_v26 = vrot.slane %v985_v39, 2 }
  0xbb   : > { %v993_v41 = vrot.slane %v992_v40, 2  ;;  %v1000_v42 = vrot.slane %v999_v33, 2  ;;  %v1007_v43 = vrot.slane %v1006_v20, 2  ;;  %v1014_v0 = vrot.slane %v1013_v53, 2 }
  0xbc   : > { %v1021_v44 = vrot.slane %v1020_v37, 2  ;;  %v1028_v31 = vrot.slane %v1027_v38, 2  ;;  %v980_v2 = vadd.f32 %v979_v25, %v978_v36  ;;  %v987_v3 = vadd.f32 %v986_v26, %v985_v39 }
  0xbd   : > { %v994_v6 = vadd.f32 %v993_v41, %v992_v40  ;;  %v1001_v7 = vadd.f32 %v1000_v42, %v999_v33  ;;  %v1008_v8 = vadd.f32 %v1007_v43, %v1006_v20  ;;  %v1015_v11 = vadd.f32 %v1014_v0, %v1013_v53 }
  0xbe   : > { %v2974_v12 = vadd.f32 %v1021_v44, %v1020_v37  ;;  %v2976_v15 = vadd.f32 %v1028_v31, %v1027_v38  ;;  %v981_v18 = vrot.slane %v980_v2, 1  ;;  %v988_v21 = vrot.slane %v987_v3, 1 }
  0xbf   : > { %v995_v63 = vrot.slane %v994_v6, 1  ;;  %v1002_v29 = vrot.slane %v1001_v7, 1  ;;  %v974_v56 = vunpack.c.l.bf16 %v943_v45  ;;  %v975_v30 = vunpack.c.h.bf16 %v943_v45 }
  0xc0   : > { %v1009_v57 = vrot.slane %v1008_v8, 1  ;;  %v1016_v32 = vrot.slane %v1015_v11, 1  ;;  %v2978_v13 = vadd.f32 %v981_v18, %v980_v2  ;;  %v2980_v14 = vadd.f32 %v988_v21, %v987_v3 }
  0xc1   : > { %v1023_v52 = vrot.slane %v2974_v12, 1  ;;  %v1030_v54 = vrot.slane %v2976_v15, 1  ;;  %v996_v58 = vadd.f32 %v995_v63, %v994_v6  ;;  %v1003_v34 = vadd.f32 %v1002_v29, %v1001_v7 }
  0xc2   : > { %v2984_v19 = vadd.f32 %v1009_v57, %v1008_v8  ;;  %v2986_v55 = vadd.f32 %v1016_v32, %v1015_v11  ;;  %v1032_v35 = vadd.f32 %v962_v24, %v960_v22  ;;  %v1039_v59 = vadd.f32 %v963_v27, %v961_v23 }
  0xc3   : > { %v1046_v36 = vadd.f32 %v966_v47, %v964_v28  ;;  %v1053_v39 = vadd.f32 %v967_v48, %v965_v46  ;;  %v1060_v22 = vadd.f32 %v970_v51, %v968_v49  ;;  %v1067_v1 = vadd.f32 %v971_v60, %v969_v50 }
  0xc4   : > { %v1074_v4 = vadd.f32 %v974_v56, %v972_v61  ;;  %v1081_v23 = vadd.f32 %v975_v30, %v973_v62  ;;  %v1033_v5 = vrot.slane %v1032_v35, 4  ;;  %v1040_v24 = vrot.slane %v1039_v59, 4 }
  0xc5   : > { %v1047_v9 = vrot.slane %v1046_v36, 4  ;;  %v1054_v27 = vrot.slane %v1053_v39, 4  ;;  %v1061_v28 = vrot.slane %v1060_v22, 4  ;;  %v1068_v46 = vrot.slane %v1067_v1, 4 }
  0xc6   : > { %v1075_v47 = vrot.slane %v1074_v4, 4  ;;  %v1082_v48 = vrot.slane %v1081_v23, 4  ;;  %v1034_v49 = vadd.f32 %v1033_v5, %v1032_v35  ;;  %v1041_v51 = vadd.f32 %v1040_v24, %v1039_v59  ;;  %v3019_v35 = vld [vmem:[%s2799_s21] sm:$0xff] }
  0xc7   : > { %v1048_v10 = vadd.f32 %v1047_v9, %v1046_v36  ;;  %v1055_v40 = vadd.f32 %v1054_v27, %v1053_v39  ;;  %v1062_v16 = vadd.f32 %v1061_v28, %v1060_v22  ;;  %v1069_v50 = vadd.f32 %v1068_v46, %v1067_v1  ;;  %v1130_v24 = vld [vmem:[%s2799_s21 + $0x20] sm:$0xff]  ;;  %v926_v27 = vld [vmem:[#allocation11] sm:$0xff] }
  0xc8   : > { %v1076_v60 = vadd.f32 %v1075_v47, %v1074_v4  ;;  %v1083_v33 = vadd.f32 %v1082_v48, %v1081_v23  ;;  %v1035_v61 = vrot.slane %v1034_v49, 2  ;;  %v1042_v20 = vrot.slane %v1041_v51, 2  ;;  %v1128_v4 = vld [vmem:[%s2799_s21 + $0x10] sm:$0xff]  ;;  %v927_v28 = vld [vmem:[#allocation11 + $0x8] sm:$0xff]  ;;  %v1131_v48 = vld [vmem:[%s2799_s21 + $0x28] sm:$0xff] }
  0xc9   : > { %v1049_v17 = vrot.slane %v1048_v10, 2  ;;  %v1056_v62 = vrot.slane %v1055_v40, 2  ;;  %v1063_v53 = vrot.slane %v1062_v16, 2  ;;  %v1070_v37 = vrot.slane %v1069_v50, 2 }
  0xca   : > { %v1077_v38 = vrot.slane %v1076_v60, 2  ;;  %v1084_v25 = vrot.slane %v1083_v33, 2  ;;  %v1036_v26 = vadd.f32 %v1035_v61, %v1034_v49  ;;  %v1043_v41 = vadd.f32 %v1042_v20, %v1041_v51 }
  0xcb   : > { %v1050_v42 = vadd.f32 %v1049_v17, %v1048_v10  ;;  %v1057_v43 = vadd.f32 %v1056_v62, %v1055_v40  ;;  %v1064_v0 = vadd.f32 %v1063_v53, %v1062_v16  ;;  %v1071_v44 = vadd.f32 %v1070_v37, %v1069_v50  ;;  %v1132_v16 = vld [vmem:[%s2799_s21 + $0x30] sm:$0xff]  ;;  %v1133_v50 = vld [vmem:[%s2799_s21 + $0x38] sm:$0xff]  ;;  %v3053_v17 = vld [vmem:[%s2799_s21 + $0x40] sm:$0xff] }
  0xcc   : > { %v1078_v31 = vadd.f32 %v1077_v38, %v1076_v60  ;;  %v1085_v45 = vadd.f32 %v1084_v25, %v1083_v33  ;;  %v1037_v2 = vrot.slane %v1036_v26, 1  ;;  %v1044_v3 = vrot.slane %v1043_v41, 1  ;;  %v3056_v62 = vld [vmem:[%s2799_s21 + $0x48] sm:$0xff] }
  0xcd   : > { %v1051_v6 = vrot.slane %v1050_v42, 1  ;;  %v1058_v7 = vrot.slane %v1057_v43, 1  ;;  %v1065_v8 = vrot.slane %v1064_v0, 1  ;;  %v1072_v11 = vrot.slane %v1071_v44, 1 }
  0xce   : > { %v1079_v18 = vrot.slane %v1078_v31, 1  ;;  %v1086_v21 = vrot.slane %v1085_v45, 1  ;;  %v1024_v63 = vadd.f32 %v1023_v52, %v2974_v12  ;;  %v1031_v29 = vadd.f32 %v1030_v54, %v2976_v15  ;;  %v3026_v12 = vld [vmem:[%s2799_s21 + $0x8] sm:$0xff] }
  0xcf   : > { %v1038_v56 = vadd.f32 %v1037_v2, %v1036_v26  ;;  %v1045_v30 = vadd.f32 %v1044_v3, %v1043_v41  ;;  %v1052_v57 = vadd.f32 %v1051_v6, %v1050_v42  ;;  %v1059_v32 = vadd.f32 %v1058_v7, %v1057_v43  ;;  %v3059_v26 = vld [vmem:[%s2799_s21 + $0x50] sm:$0xff]  ;;  %v3062_v41 = vld [vmem:[%s2799_s21 + $0x58] sm:$0xff] }
  0xd0   : > { %v1066_v59 = vadd.f32 %v1065_v8, %v1064_v0  ;;  %v1073_v36 = vadd.f32 %v1072_v11, %v1071_v44  ;;  %v1104_v39 = vsel %vm899_vm0, %v996_v58, %v2978_v13  ;;  %v1111_v22 = vsel %vm899_vm0, %v1003_v34, %v2980_v14  ;;  %v1129_v13 = vld [vmem:[%s2799_s21 + $0x18] sm:$0xff]  ;;  %v3065_v0 = vld [vmem:[%s2799_s21 + $0x60] sm:$0xff]  ;;  %v3068_v44 = vld [vmem:[%s2799_s21 + $0x68] sm:$0xff] }
  0xd1   : > { %v1080_v52 = vadd.f32 %v1079_v18, %v1078_v31  ;;  %v1087_v15 = vadd.f32 %v1086_v21, %v1085_v45  ;;  %v1105_v54 = vsel %vm901_vm1, %v2984_v19, %v1104_v39  ;;  %v1112_v1 = vsel %vm901_vm1, %v2986_v55, %v1111_v22 }
  0xd2   : > { %v1106_v23 = vsel %vm903_vm2, %v1024_v63, %v1105_v54  ;;  %v1113_v5 = vsel %vm903_vm2, %v1031_v29, %v1112_v1  ;;  %v1142_v58 = vunpack.c.l.bf16 %v3019_v35  ;;  %v1143_v14 = vunpack.c.h.bf16 %v3019_v35 }
  0xd3   : > { %v1107_v34 = vsel %vm905_vm3, %v1038_v56, %v1106_v23  ;;  %v1114_v19 = vsel %vm905_vm3, %v1045_v30, %v1113_v5  ;;  %v1144_v55 = vunpack.c.l.bf16 %v3026_v12  ;;  %v1145_v9 = vunpack.c.h.bf16 %v3026_v12 }
  0xd4   : > { %v1108_v46 = vsel %vm907_vm4, %v1052_v57, %v1107_v34  ;;  %v1115_v47 = vsel %vm907_vm4, %v1059_v32, %v1114_v19  ;;  %v1146_v49 = vunpack.c.l.bf16 %v1128_v4  ;;  %v1147_v51 = vunpack.c.h.bf16 %v1128_v4 }
  0xd5   : > { %v1109_v10 = vsel %vm909_vm5, %v1066_v59, %v1108_v46  ;;  %v1116_v40 = vsel %vm909_vm5, %v1073_v36, %v1115_v47  ;;  %v1148_v60 = vunpack.c.l.bf16 %v1129_v13  ;;  %v1149_v33 = vunpack.c.h.bf16 %v1129_v13 }
  0xd6   : > { %v1110_v61 = vsel %vm911_vm6, %v1080_v52, %v1109_v10  ;;  %v1117_v20 = vsel %vm911_vm6, %v1087_v15, %v1116_v40  ;;  %v1150_v53 = vunpack.c.l.bf16 %v1130_v24  ;;  %v1151_v37 = vunpack.c.h.bf16 %v1130_v24 }
  0xd7   : > { %v1120_v38 = vadd.f32 %v1110_v61, %v926_v27  ;;  %v1121_v25 = vadd.f32 %v1117_v20, %v927_v28  ;;  %v1152_v42 = vunpack.c.l.bf16 %v1131_v48  ;;  %v1153_v43 = vunpack.c.h.bf16 %v1131_v48 }
  0xd8   : > { %v1154_v31 = vunpack.c.l.bf16 %v1132_v16  ;;  %v1155_v45 = vunpack.c.h.bf16 %v1132_v16  ;;  %v1156_v2 = vunpack.c.l.bf16 %v1133_v50  ;;  %v1157_v3 = vunpack.c.h.bf16 %v1133_v50 }
  0xd9   : > { %1122 = vst [vmem:[#allocation11] sm:$0xff] %v1120_v38  ;;  %1123 = vst [vmem:[#allocation11 + $0x8] sm:$0xff] %v1121_v25  ;;  %v1158_v6 = vunpack.c.l.bf16 %v3053_v17  ;;  %v1159_v7 = vunpack.c.h.bf16 %v3053_v17  ;;  %v1160_v8 = vunpack.c.l.bf16 %v3056_v62  ;;  %v1161_v11 = vunpack.c.h.bf16 %v3056_v62 }
  0xda   : > { %v1162_v18 = vunpack.c.l.bf16 %v3059_v26  ;;  %v1163_v21 = vunpack.c.h.bf16 %v3059_v26  ;;  %v1164_v63 = vunpack.c.l.bf16 %v3062_v41  ;;  %v1165_v29 = vunpack.c.h.bf16 %v3062_v41 }
  0xdb   : > { %v1166_v56 = vunpack.c.l.bf16 %v3065_v0  ;;  %v1167_v30 = vunpack.c.h.bf16 %v3065_v0  ;;  %v1168_v57 = vunpack.c.l.bf16 %v3068_v44  ;;  %v1169_v32 = vunpack.c.h.bf16 %v3068_v44 }
  0xdc   : > { %v1174_v35 = vadd.f32 %v1144_v55, %v1142_v58  ;;  %v1181_v59 = vadd.f32 %v1145_v9, %v1143_v14  ;;  %v1188_v36 = vadd.f32 %v1148_v60, %v1146_v49  ;;  %v1195_v39 = vadd.f32 %v1149_v33, %v1147_v51  ;;  %v1140_v60 = vld [vmem:[%s2799_s21 + $0x70] sm:$0xff]  ;;  %v1141_v33 = vld [vmem:[%s2799_s21 + $0x78] sm:$0xff] }
  0xdd   : > { %v1202_v22 = vadd.f32 %v1152_v42, %v1150_v53  ;;  %v1209_v12 = vadd.f32 %v1153_v43, %v1151_v37  ;;  %v1216_v52 = vadd.f32 %v1156_v2, %v1154_v31  ;;  %v1223_v15 = vadd.f32 %v1157_v3, %v1155_v45 }
  0xde   : > { %v1175_v54 = vrot.slane %v1174_v35, 4  ;;  %v1182_v1 = vrot.slane %v1181_v59, 4  ;;  %v1189_v4 = vrot.slane %v1188_v36, 4  ;;  %v1196_v23 = vrot.slane %v1195_v39, 4 }
  0xdf   : > { %v1203_v5 = vrot.slane %v1202_v22, 4  ;;  %v1210_v13 = vrot.slane %v1209_v12, 4  ;;  %v1217_v34 = vrot.slane %v1216_v52, 4  ;;  %v1224_v19 = vrot.slane %v1223_v15, 4 }
  0xe0   : > { %v1176_v24 = vadd.f32 %v1175_v54, %v1174_v35  ;;  %v1183_v27 = vadd.f32 %v1182_v1, %v1181_v59  ;;  %v1190_v58 = vadd.f32 %v1189_v4, %v1188_v36  ;;  %v1197_v14 = vadd.f32 %v1196_v23, %v1195_v39 }
  0xe1   : > { %v1204_v55 = vadd.f32 %v1203_v5, %v1202_v22  ;;  %v1211_v9 = vadd.f32 %v1210_v13, %v1209_v12  ;;  %v1218_v28 = vadd.f32 %v1217_v34, %v1216_v52  ;;  %v1225_v46 = vadd.f32 %v1224_v19, %v1223_v15 }
  0xe2   : > { %v1177_v47 = vrot.slane %v1176_v24, 2  ;;  %v1184_v48 = vrot.slane %v1183_v27, 2  ;;  %v1191_v49 = vrot.slane %v1190_v58, 2  ;;  %v1198_v51 = vrot.slane %v1197_v14, 2 }
  0xe3   : > { %v1205_v10 = vrot.slane %v1204_v55, 2  ;;  %v1212_v40 = vrot.slane %v1211_v9, 2  ;;  %v1219_v16 = vrot.slane %v1218_v28, 2  ;;  %v1226_v50 = vrot.slane %v1225_v46, 2 }
  0xe4   : > { %v1178_v61 = vadd.f32 %v1177_v47, %v1176_v24  ;;  %v1185_v20 = vadd.f32 %v1184_v48, %v1183_v27  ;;  %v1192_v53 = vadd.f32 %v1191_v49, %v1190_v58  ;;  %v1199_v37 = vadd.f32 %v1198_v51, %v1197_v14 }
  0xe5   : > { %v3084_v38 = vadd.f32 %v1205_v10, %v1204_v55  ;;  %v3086_v25 = vadd.f32 %v1212_v40, %v1211_v9  ;;  %v3088_v42 = vadd.f32 %v1219_v16, %v1218_v28  ;;  %v3090_v43 = vadd.f32 %v1226_v50, %v1225_v46 }
  0xe6   : > { %v1179_v31 = vrot.slane %v1178_v61, 1  ;;  %v1186_v45 = vrot.slane %v1185_v20, 1  ;;  %v1193_v2 = vrot.slane %v1192_v53, 1  ;;  %v1200_v3 = vrot.slane %v1199_v37, 1 }
  0xe7   : > { %v1170_v35 = vunpack.c.l.bf16 %v1140_v60  ;;  %v1171_v59 = vunpack.c.h.bf16 %v1140_v60  ;;  %v1172_v36 = vunpack.c.l.bf16 %v1141_v33  ;;  %v1173_v39 = vunpack.c.h.bf16 %v1141_v33 }
  0xe8   : > { %v1207_v22 = vrot.slane %v3084_v38, 1  ;;  %v1214_v12 = vrot.slane %v3086_v25, 1  ;;  %v1221_v52 = vrot.slane %v3088_v42, 1  ;;  %v1228_v15 = vrot.slane %v3090_v43, 1 }
  0xe9   : > { %v1180_v54 = vadd.f32 %v1179_v31, %v1178_v61  ;;  %v1187_v1 = vadd.f32 %v1186_v45, %v1185_v20  ;;  %v1194_v4 = vadd.f32 %v1193_v2, %v1192_v53  ;;  %v1201_v23 = vadd.f32 %v1200_v3, %v1199_v37 }
  0xea   : > { %v1230_v5 = vadd.f32 %v1160_v8, %v1158_v6  ;;  %v1237_v13 = vadd.f32 %v1161_v11, %v1159_v7  ;;  %v1244_v34 = vadd.f32 %v1164_v63, %v1162_v18  ;;  %v1251_v19 = vadd.f32 %v1165_v29, %v1163_v21 }
  0xeb   : > { %v1258_v6 = vadd.f32 %v1168_v57, %v1166_v56  ;;  %v1265_v17 = vadd.f32 %v1169_v32, %v1167_v30  ;;  %v1272_v62 = vadd.f32 %v1172_v36, %v1170_v35  ;;  %v1279_v7 = vadd.f32 %v1173_v39, %v1171_v59 }
  0xec   : > { %v1231_v8 = vrot.slane %v1230_v5, 4  ;;  %v1238_v11 = vrot.slane %v1237_v13, 4  ;;  %v1245_v18 = vrot.slane %v1244_v34, 4  ;;  %v1252_v63 = vrot.slane %v1251_v19, 4 }
  0xed   : > { %v1259_v26 = vrot.slane %v1258_v6, 4  ;;  %v1266_v24 = vrot.slane %v1265_v17, 4  ;;  %v1273_v41 = vrot.slane %v1272_v62, 4  ;;  %v1280_v21 = vrot.slane %v1279_v7, 4 }
  0xee   : > { %v1232_v29 = vadd.f32 %v1231_v8, %v1230_v5  ;;  %v1239_v27 = vadd.f32 %v1238_v11, %v1237_v13  ;;  %v1246_v58 = vadd.f32 %v1245_v18, %v1244_v34  ;;  %v1253_v14 = vadd.f32 %v1252_v63, %v1251_v19  ;;  %v1124_v8 = vld [vmem:[#allocation13] sm:$0xff] }
  0xef   : > { %v1260_v56 = vadd.f32 %v1259_v26, %v1258_v6  ;;  %v1267_v57 = vadd.f32 %v1266_v24, %v1265_v17  ;;  %v1274_v0 = vadd.f32 %v1273_v41, %v1272_v62  ;;  %v1281_v55 = vadd.f32 %v1280_v21, %v1279_v7  ;;  %v1326_v41 = vld [vmem:[#allocation10] sm:$0xff] (!%p1971_p1)  ;;  %v1327_v21 = vld [vmem:[#allocation10 + $0x8] sm:$0xff] (!%p1971_p1) }
  0xf0   : > { %v1233_v44 = vrot.slane %v1232_v29, 2  ;;  %v1240_v30 = vrot.slane %v1239_v27, 2  ;;  %v1247_v32 = vrot.slane %v1246_v58, 2  ;;  %v1254_v9 = vrot.slane %v1253_v14, 2 }
  0xf1   : > { %v1261_v28 = vrot.slane %v1260_v56, 2  ;;  %v1268_v46 = vrot.slane %v1267_v57, 2  ;;  %v1275_v47 = vrot.slane %v1274_v0, 2  ;;  %v1282_v48 = vrot.slane %v1281_v55, 2 }
  0xf2   : > { %v1234_v49 = vadd.f32 %v1233_v44, %v1232_v29  ;;  %v1241_v51 = vadd.f32 %v1240_v30, %v1239_v27  ;;  %v1248_v10 = vadd.f32 %v1247_v32, %v1246_v58  ;;  %v1255_v40 = vadd.f32 %v1254_v9, %v1253_v14  ;;  %v1410_v58 = vld [vmem:[#allocation11] sm:$0xff] (!%p1971_p1) }
  0xf3   : > { %v1262_v16 = vadd.f32 %v1261_v28, %v1260_v56  ;;  %v1269_v50 = vadd.f32 %v1268_v46, %v1267_v57  ;;  %v1276_v60 = vadd.f32 %v1275_v47, %v1274_v0  ;;  %v1283_v33 = vadd.f32 %v1282_v48, %v1281_v55  ;;  %v1411_v56 = vld [vmem:[#allocation11 + $0x8] sm:$0xff] (!%p1971_p1) }
  0xf4   : > { %v1235_v61 = vrot.slane %v1234_v49, 1  ;;  %v1242_v20 = vrot.slane %v1241_v51, 1  ;;  %v1249_v53 = vrot.slane %v1248_v10, 1  ;;  %v1256_v37 = vrot.slane %v1255_v40, 1 }
  0xf5   : > { %v1208_v31 = vadd.f32 %v1207_v22, %v3084_v38  ;;  %v1215_v45 = vadd.f32 %v1214_v12, %v3086_v25  ;;  %v1263_v2 = vrot.slane %v1262_v16, 1  ;;  %v1270_v3 = vrot.slane %v1269_v50, 1 }
  0xf6   : > { %v1222_v35 = vadd.f32 %v1221_v52, %v3088_v42  ;;  %v1229_v59 = vadd.f32 %v1228_v15, %v3090_v43  ;;  %v1277_v36 = vrot.slane %v1276_v60, 1  ;;  %v1284_v39 = vrot.slane %v1283_v33, 1 }
  0xf7   : > { %v1236_v5 = vadd.f32 %v1235_v61, %v1234_v49  ;;  %v1243_v13 = vadd.f32 %v1242_v20, %v1241_v51  ;;  %v1250_v34 = vadd.f32 %v1249_v53, %v1248_v10  ;;  %v1257_v19 = vadd.f32 %v1256_v37, %v1255_v40 }
  0xf8   : > { %v1302_v6 = vsel %vm899_vm0, %v1194_v4, %v1180_v54  ;;  %v1309_v17 = vsel %vm899_vm0, %v1201_v23, %v1187_v1  ;;  %v1264_v62 = vadd.f32 %v1263_v2, %v1262_v16  ;;  %v1271_v38 = vadd.f32 %v1270_v3, %v1269_v50  ;;  %v1125_v54 = vld [vmem:[#allocation13 + $0x8] sm:$0xff] }
  0xf9   : > { %v1303_v25 = vsel %vm901_vm1, %v1208_v31, %v1302_v6  ;;  %v1310_v22 = vsel %vm901_vm1, %v1215_v45, %v1309_v17  ;;  %v1278_v12 = vadd.f32 %v1277_v36, %v1276_v60  ;;  %v1285_v42 = vadd.f32 %v1284_v39, %v1283_v33 }
  0xfa   : > { %v1304_v43 = vsel %vm903_vm2, %v1222_v35, %v1303_v25  ;;  %v1311_v52 = vsel %vm903_vm2, %v1229_v59, %v1310_v22  ;;  %v1328_v29 = vmul.f32 (!%p1971_p1), 0.015625, %v1326_v41  ;;  %v1329_v27 = vmul.f32 (!%p1971_p1), 0.015625, %v1327_v21 }
  0xfb   : > { %v1305_v15 = vsel %vm905_vm3, %v1236_v5, %v1304_v43  ;;  %v1312_v7 = vsel %vm905_vm3, %v1243_v13, %v1311_v52  ;;  %1325 = sbr.rel (%p1971_p1) target bundleno = 322 (0x142), region = 64  ;;  %v1412_v14 = vmul.f32 (!%p1971_p1), 0.015625, %v1410_v58  ;;  %v1413_v55 = vmul.f32 (!%p1971_p1), 0.015625, %v1411_v56 }
  0xfc   : > { %v1306_v1 = vsel %vm907_vm4, %v1250_v34, %v1305_v15  ;;  %v1313_v4 = vsel %vm907_vm4, %v1257_v19, %v1312_v7  ;;  %1330 = vst [vmem:[#allocation10] sm:$0xff] (!%p1971_p1), %v1328_v29  ;;  %v1332_v57 = vrot.slane (!%p1971_p1), %v1328_v29, 4  ;;  %1331 = vst [vmem:[#allocation10 + $0x8] sm:$0xff] (!%p1971_p1), %v1329_v27  ;;  %v1338_v0 = vrot.slane (!%p1971_p1), %v1329_v27, 4 }
  0xfd   : > { %v1307_v23 = vsel %vm909_vm5, %v1264_v62, %v1306_v1  ;;  %v1314_v11 = vsel %vm909_vm5, %v1271_v38, %v1313_v4  ;;  %1414 = vst [vmem:[#allocation11] sm:$0xff] (!%p1971_p1), %v1412_v14  ;;  %v1416_v44 = vrot.slane (!%p1971_p1), %v1412_v14, 4  ;;  %1415 = vst [vmem:[#allocation11 + $0x8] sm:$0xff] (!%p1971_p1), %v1413_v55  ;;  %v1422_v28 = vrot.slane (!%p1971_p1), %v1413_v55, 4 }
  0xfe   : > { %v1308_v18 = vsel %vm911_vm6, %v1278_v12, %v1307_v23  ;;  %v1315_v63 = vsel %vm911_vm6, %v1285_v42, %v1314_v11  ;;  %v1333_v32 = vadd.f32 (!%p1971_p1), %v1332_v57, %v1328_v29  ;;  %v1339_v9 = vadd.f32 (!%p1971_p1), %v1338_v0, %v1329_v27 }
  0xff   : > { %v1318_v26 = vadd.f32 %v1308_v18, %v1124_v8  ;;  %v1319_v24 = vadd.f32 %v1315_v63, %v1125_v54  ;;  %v1417_v49 = vadd.f32 (!%p1971_p1), %v1416_v44, %v1412_v14  ;;  %v1423_v51 = vadd.f32 (!%p1971_p1), %v1422_v28, %v1413_v55 }
 0x100   : > { %v1334_v47 = vrot.slane (!%p1971_p1), %v1333_v32, 2  ;;  %v1340_v48 = vrot.slane (!%p1971_p1), %v1339_v9, 2 }
 0x101   : > { %1320 = vst [vmem:[#allocation13] sm:$0xff] %v1318_v26  ;;  %1321 = vst [vmem:[#allocation13 + $0x8] sm:$0xff] %v1319_v24  ;;  %v1418_v50 = vrot.slane (!%p1971_p1), %v1417_v49, 2  ;;  %v1424_v60 = vrot.slane (!%p1971_p1), %v1423_v51, 2 }
 0x102   : > { %v1335_v40 = vadd.f32 %v1334_v47, %v1333_v32  ;;  %v1341_v16 = vadd.f32 %v1340_v48, %v1339_v9 }
 0x103   : > { %v1419_v37 = vadd.f32 %v1418_v50, %v1417_v49  ;;  %v1425_v31 = vadd.f32 %v1424_v60, %v1423_v51 }
 0x104   : > { %v1336_v20 = vrot.slane %v1335_v40, 1  ;;  %v1342_v53 = vrot.slane %v1341_v16, 1 }
 0x105   : > { %v1420_v59 = vrot.slane %v1419_v37, 1  ;;  %v1426_v36 = vrot.slane %v1425_v31, 1 }
 0x106   : > { %v1337_v3 = vadd.f32 %v1336_v20, %v1335_v40  ;;  %v1343_v35 = vadd.f32 %v1342_v53, %v1341_v16 }
 0x107   : > { %v1421_v19 = vadd.f32 %v1420_v59, %v1419_v37  ;;  %v1427_v6 = vadd.f32 %v1426_v36, %v1425_v31 }
 0x108   : > { %v1495_v30 = vld [vmem:[#allocation13] sm:$0xff]  ;;  %v1496_v10 = vld [vmem:[#allocation13 + $0x8] sm:$0xff]  ;;  %v1345_v13 = vmul.f32 0.125, %v1337_v3  ;;  %v1346_v34 = vmul.f32 0.125, %v1343_v35  ;;  %v1373_v3 = vlaneseq }
 0x109   : > { %v1497_v46 = vmul.f32 0.015625, %v1495_v30  ;;  %v1498_v61 = vmul.f32 0.015625, %v1496_v10  ;;  %v1428_v22 = vmul.f32 0.125, %v1421_v19  ;;  %v1429_v12 = vmul.f32 0.125, %v1427_v6 }
 0x10a   : > { %v3139_v38 = vsub.f32 %v1328_v29, %v1345_v13  ;;  %v3141_v25 = vsub.f32 %v1329_v27, %v1346_v34 }
 0x10b   : > { %1499 = vst [vmem:[#allocation13] sm:$0xff] %v1497_v46  ;;  %v1501_v33 = vrot.slane %v1497_v46, 4  ;;  %1500 = vst [vmem:[#allocation13 + $0x8] sm:$0xff] %v1498_v61  ;;  %v1507_v2 = vrot.slane %v1498_v61, 4  ;;  %v3147_v7 = vsub.f32 %v1412_v14, %v1428_v22  ;;  %v3149_v8 = vsub.f32 %v1413_v55, %v1429_v12 }
 0x10c   : > { %v1349_v52 = vmul.f32 %v3139_v38, %v3139_v38  ;;  %v1350_v15 = vmul.f32 %v3141_v25, %v3141_v25 }
 0x10d   : > { %v1502_v45 = vadd.f32 %v1501_v33, %v1497_v46  ;;  %v1508_v5 = vadd.f32 %v1507_v2, %v1498_v61  ;;  %v1432_v11 = vmul.f32 %v3147_v7, %v3147_v7  ;;  %v1433_v18 = vmul.f32 %v3149_v8, %v3149_v8 }
 0x10e   : > { %v1351_v4 = vrot.slane %v1349_v52, 4  ;;  %v1357_v23 = vrot.slane %v1350_v15, 4 }
 0x10f   : > { %v1503_v39 = vrot.slane %v1502_v45, 2  ;;  %v1509_v62 = vrot.slane %v1508_v5, 2  ;;  %v1434_v21 = vrot.slane %v1432_v11, 4  ;;  %v1440_v29 = vrot.slane %v1433_v18, 4 }
 0x110   : > { %v1352_v24 = vadd.f32 %v1351_v4, %v1349_v52  ;;  %v1358_v41 = vadd.f32 %v1357_v23, %v1350_v15 }
 0x111   : > { %v1504_v17 = vadd.f32 %v1503_v39, %v1502_v45  ;;  %v1510_v42 = vadd.f32 %v1509_v62, %v1508_v5  ;;  %v1435_v57 = vadd.f32 %v1434_v21, %v1432_v11  ;;  %v1441_v0 = vadd.f32 %v1440_v29, %v1433_v18  ;;  %v1385_v11 = vld [vmem:[#allocation8] ss:$4 sm:$0x3]  ;;  %v1973_v18 = vld [vmem:[%s3396_s3 + $0x1] ss:$4 sm:$0x3] }
 0x112   : > { %v1353_v14 = vrot.slane %v1352_v24, 2  ;;  %v1359_v56 = vrot.slane %v1358_v41, 2  ;;  %v1374_v62 = vshrl.u32 %v1373_v3, 7 }
 0x113   : > { %v1505_v43 = vrot.slane %v1504_v17, 1  ;;  %v1511_v1 = vrot.slane %v1510_v42, 1  ;;  %v1436_v9 = vrot.slane %v1435_v57, 2  ;;  %v1442_v28 = vrot.slane %v1441_v0, 2 }
 0x114   : > { %v1354_v30 = vadd.f32 %v1353_v14, %v1352_v24  ;;  %v1360_v32 = vadd.f32 %v1359_v56, %v1358_v41  ;;  %v1375_v52 = vsub.s32 0, %v1374_v62  ;;  %v1379_v4 = vsub.s32 1, %v1374_v62  ;;  %v1470_v41 = vld [vmem:[#allocation8 + $0x1] ss:$4 sm:$0x3] }
 0x115   : > { %v1506_v54 = vadd.f32 %v1505_v43, %v1504_v17  ;;  %v1512_v26 = vadd.f32 %v1511_v1, %v1510_v42  ;;  %v1437_v51 = vadd.f32 %v1436_v9, %v1435_v57  ;;  %v1443_v10 = vadd.f32 %v1442_v28, %v1441_v0  ;;  %v1371_v1 = vld [vmem:[%s3396_s3] ss:$4 sm:$0x3] }
 0x116   : > { %v1361_v49 = vrot.slane %v1360_v32, 1  ;;  %v1380_v24 = vrot.slane %v1371_v1, %v1379_v4  ;;  %v1460_v14 = vrot.slane %v1973_v18, %v1375_v52  ;;  %v1394_v0 = vrot.slane %v1385_v11, %v1379_v4 }
 0x117   : > { %v1513_v63 = vmul.f32 0.125, %v1506_v54  ;;  %v1514_v58 = vmul.f32 0.125, %v1512_v26  ;;  %v1438_v33 = vrot.slane %v1437_v51, 1  ;;  %v1444_v20 = vrot.slane %v1443_v10, 1 }
 0x118   : > { %v1362_v60 = vadd.f32 %v1361_v49, %v1360_v32  ;;  %v1475_v28 = vrot.slane %v1470_v41, %v1375_v52  ;;  %v1555_v49 = vld [vmem:[#allocation8 + $0x2] ss:$4 sm:$0x3] }
 0x119   : > { %v3155_v27 = vsub.f32 %v1497_v46, %v1513_v63  ;;  %v3159_v44 = vsub.f32 %v1498_v61, %v1514_v58  ;;  %v1355_v46 = vrot.slane %v1354_v30, 1  ;;  %v1439_v45 = vadd.f32 %v1438_v33, %v1437_v51 }
 0x11a   : > { %v1364_v31 = vmul.f32 0.125, %v1362_v60  ;;  %v1445_v2 = vadd.f32 %v1444_v20, %v1443_v10  ;;  %v1376_v63 = vrot.slane %v1371_v1, %v1375_v52  ;;  %v1390_v58 = vrot.slane %v1385_v11, %v1375_v52 }
 0x11b   : > { %v1517_v55 = vmul.f32 %v3155_v27, %v3155_v27  ;;  %v1518_v48 = vmul.f32 %v3159_v44, %v3159_v44  ;;  %v1356_v50 = vadd.f32 %v1355_v46, %v1354_v30  ;;  %v1446_v5 = vmul.f32 0.125, %v1439_v45 }
 0x11c   : > { %v1366_v39 = vadd.f32 1e-05, %v1364_v31  ;;  %v1447_v13 = vmul.f32 0.125, %v1445_v2  ;;  %v1560_v33 = vrot.slane %v1555_v49, %v1375_v52  ;;  %v1564_v2 = vrot.slane %v1555_v49, %v1379_v4 }
 0x11d   : > { %v1519_v47 = vrot.slane %v1517_v55, 4  ;;  %v1525_v16 = vrot.slane %v1518_v48, 4  ;;  %v1363_v37 = vmul.f32 0.125, %v1356_v50  ;;  %v1448_v6 = vadd.f32 1e-05, %v1446_v5 }
 0x11e   : > { %v1449_v17 = vadd.f32 1e-05, %v1447_v13 }
 0x11f   : > { %v1520_v40 = vadd.f32 %v1519_v47, %v1517_v55  ;;  %v1526_v53 = vadd.f32 %v1525_v16, %v1518_v48  ;;  %v1365_v36 = vadd.f32 1e-05, %v1363_v37  ;;  %v1464_v55 = vrot.slane %v1973_v18, %v1379_v4  ;;  %v1975_v47 = vld [vmem:[%s3396_s3 + $0x2] ss:$4 sm:$0x3] }
 0x120   : > { %v1545_v16 = vrot.slane %v1975_v47, %v1375_v52 }
 0x121   : > { %v1521_v61 = vrot.slane %v1520_v40, 2  ;;  %v1527_v59 = vrot.slane %v1526_v53, 2  ;;  %2174 = vrsqrt.f32 %v1365_v36 }
 0x122   : > { %2176 = vrsqrt.f32 %v1366_v39 }
 0x123   : > { %v1522_v35 = vadd.f32 %v1521_v61, %v1520_v40  ;;  %v1528_v19 = vadd.f32 %v1527_v59, %v1526_v53  ;;  %2178 = vrsqrt.f32 %v1448_v6  ;;  %v1549_v53 = vrot.slane %v1975_v47, %v1379_v4 }
 0x124   : > { %2180 = vrsqrt.f32 %v1449_v17 }
 0x125   : > { %v1523_v34 = vrot.slane %v1522_v35, 1  ;;  %v1529_v12 = vrot.slane %v1528_v19, 1 }
 0x127   : > { %v1524_v22 = vadd.f32 %v1523_v34, %v1522_v35  ;;  %v1530_v43 = vadd.f32 %v1529_v12, %v1528_v19 }
 0x129   : > { %v1531_v42 = vmul.f32 0.125, %v1524_v22  ;;  %v1532_v54 = vmul.f32 0.125, %v1530_v43 }
 0x12b   : > { %v1533_v15 = vadd.f32 1e-05, %v1531_v42  ;;  %v1534_v23 = vadd.f32 1e-05, %v1532_v54  ;;  %v2175_v26 = vpop.eup %2174 }
 0x12c   : > { %v2177_v21 = vpop.eup %2176  ;;  %v1369_v29 = vmul.f32 %v2175_v26, %v3139_v38  ;;  %v1479_v38 = vrot.slane %v1470_v41, %v1379_v4 }
 0x12d   : > { %2182 = vrsqrt.f32 %v1533_v15  ;;  %v2179_v56 = vpop.eup %2178  ;;  %v1370_v57 = vmul.f32 %v2177_v21, %v3141_v25 }
 0x12e   : > { %2184 = vrsqrt.f32 %v1534_v23  ;;  %v2181_v30 = vpop.eup %2180  ;;  %v1383_v32 = vmul.f32 %v1376_v63, %v1369_v29  ;;  %v1452_v9 = vmul.f32 %v2179_v56, %v3147_v7 }
 0x12f   : > { %v1384_v48 = vmul.f32 %v1380_v24, %v1370_v57  ;;  %v1453_v46 = vmul.f32 %v2181_v30, %v3149_v8 }
 0x130   : > { %v1397_v51 = vadd.f32 %v1390_v58, %v1383_v32  ;;  %v1467_v10 = vmul.f32 %v1460_v14, %v1452_v9 }
 0x131   : > { %v1398_v40 = vadd.f32 %v1394_v0, %v1384_v48  ;;  %v1468_v25 = vmul.f32 %v1464_v55, %v1453_v46 }
 0x132   : > { %1399 = vst [vmem:[#allocation14] sm:$0xff] %v1397_v51  ;;  %v1482_v60 = vadd.f32 %v1475_v28, %v1467_v10 }
 0x133   : > { %1400 = vst [vmem:[#allocation14 + $0x8] sm:$0xff] %v1398_v40  ;;  %v2003_v7 = vpack.c.bf16 %v1398_v40, %v1397_v51  ;;  %v1483_v20 = vadd.f32 %v1479_v38, %v1468_v25 }
 0x134   : > { %1484 = vst [vmem:[#allocation16] sm:$0xff] %v1482_v60 }
 0x135   : > { %1409 = vst [vmem:[#allocation19] sm:$0xff] %v2003_v7  ;;  %1485 = vst [vmem:[#allocation16 + $0x8] sm:$0xff] %v1483_v20  ;;  %v2004_v8 = vpack.c.bf16 %v1483_v20, %v1482_v60 }
 0x137   : > { %v2183_v50 = vpop.eup %2182  ;;  %1494 = vst [vmem:[#allocation20] sm:$0xff] %v2004_v8 }
 0x138   : > { %v1537_v61 = vmul.f32 %v2183_v50, %v3155_v27  ;;  %v2185_v37 = vpop.eup %2184 }
 0x139   : > { %v1538_v45 = vmul.f32 %v2185_v37, %v3159_v44 }
 0x13a   : > { %v1552_v31 = vmul.f32 %v1545_v16, %v1537_v61 }
 0x13b   : > { %v1553_v35 = vmul.f32 %v1549_v53, %v1538_v45 }
 0x13c   : > { %v1567_v3 = vadd.f32 %v1560_v33, %v1552_v31 }
 0x13d   : > { %v1568_v59 = vadd.f32 %v1564_v2, %v1553_v35 }
 0x13e   : > { %1569 = vst [vmem:[#allocation17] sm:$0xff] %v1567_v3 }
 0x13f   : > { %1570 = vst [vmem:[#allocation17 + $0x8] sm:$0xff] %v1568_v59  ;;  %v2005_v36 = vpack.c.bf16 %v1568_v59, %v1567_v3 }
 0x141   : > { %1579 = vst [vmem:[#allocation22] sm:$0xff] %v2005_v36 }
 0x142 PF: > { %p2079_p2 = scmp.eq.s32.totalorder %s2656_s14, 3  ;;  %s2548_s29 = smov [#allocation11]  }
 0x143   : > { %s1604_s11 = sshll.u32 %s2548_s29, 4  ;;  %s2549_s24 = smov [#allocation14]   ;;  %s1605_s11 = int_to_ptr.vmem [resolvable:$true] %s1604_s11 }
 0x144   : > { %s1632_s13 = sshll.u32 %s2549_s24, 4  ;;  %s2214_s23 = scalar_lea.vmem %s1605_s11, 256  ;;  %s1633_s13 = int_to_ptr.vmem [resolvable:$true] %s1632_s13 }
 0x145   : > { %p2215_p4 = scmp.ne.s32.totalorder %s1605_s11, %s2214_s23  ;;  %p2221_p9 = scmp.lt.s32.totalorder %s1605_s11, %s1605_s11 }
 0x146   : > { %p2222_p11 = scmp.lt.s32.totalorder %s2214_s23, %s2214_s23 }
 0x147   : > { %p2216_p6 = pnand %p2215_p4, %p2079_p2 }
 0x148   : > { %p2223_p13 = por %p2222_p11, %p2221_p9 }
 0x149   : > { %p2217_p7 = pneg %p2216_p6 }
 0x14b   : > { %p2224_p3 = pnand %p2223_p13, %p2217_p7 }
 0x14d   : > { %2227 = shalt.err (!%p2224_p3)
}
 0x14e   : > { %s2228_s16 = scalar_lea.hbm %s3399_s6, 256 }
 0x14f   : > { %p2229_p5 = scmp.ne.s32.totalorder %s3399_s6, %s2228_s16  ;;  %p2234_p12 = scmp.lt.u32.totalorder %s2228_s16, %s3399_s6 }
 0x151   : > { %p2230_p8 = pnand %p2229_p5, %p2079_p2 }
 0x153   : > { %p2231_p10 = pneg %p2230_p8 }
 0x155   : > { %p2236_p0 = pnand %p2234_p12, %p2231_p10 }
 0x157   : > { %2239 = shalt.err (!%p2236_p0)
}
 0x158   : > { %2040 = dma.vmem_to_hbm [thread:$0]  (%p2079_p2), %s1605_s11, 256, %s3399_s6, [#allocation12]  }
 0x159   : > { %s2240_s19 = scalar_lea.vmem %s1633_s13, 256  ;;  %p2247_p7 = scmp.lt.s32.totalorder %s1633_s13, %s1633_s13 }
 0x15a   : > { %p2241_p1 = scmp.ne.s32.totalorder %s1633_s13, %s2240_s19  ;;  %p2248_p9 = scmp.lt.s32.totalorder %s2240_s19, %s2240_s19 }
 0x15c   : > { %p2242_p4 = pnand %p2241_p1, %p2079_p2  ;;  %p2249_p11 = por %p2248_p9, %p2247_p7 }
 0x15e   : > { %p2243_p6 = pneg %p2242_p4 }
 0x160   : > { %p2250_p13 = pnand %p2249_p11, %p2243_p6 }
 0x162   : > { %2253 = shalt.err (!%p2250_p13)
}
 0x163   : > { %s2254_s25 = scalar_lea.hbm %s3401_s8, 256 }
 0x164   : > { %p2255_p3 = scmp.ne.s32.totalorder %s3401_s8, %s2254_s25  ;;  %p2260_p10 = scmp.lt.u32.totalorder %s2254_s25, %s3401_s8 }
 0x166   : > { %p2256_p5 = pnand %p2255_p3, %p2079_p2 }
 0x168   : > { %p2257_p8 = pneg %p2256_p5 }
 0x16a   : > { %p2262_p12 = pnand %p2260_p10, %p2257_p8 }
 0x16c   : > { %2265 = shalt.err (!%p2262_p12)
}
 0x16d   : > { %2044 = dma.vmem_to_hbm [thread:$0]  (%p2079_p2), %s1633_s13, 256, %s3401_s8, [#allocation15]  }
 0x16e   : > { %s2550_s18 = smov [#allocation17]   ;;  %s2551_s20 = smov [#allocation20]  }
 0x16f   : > { %s1660_s16 = sshll.u32 %s2550_s18, 4  ;;  %s1688_s17 = sshll.u32 %s2551_s20, 4  ;;  %s1661_s16 = int_to_ptr.vmem [resolvable:$true] %s1660_s16  ;;  %s1689_s17 = int_to_ptr.vmem [resolvable:$true] %s1688_s17 }
 0x170   : > { %s2266_s0 = scalar_lea.vmem %s1661_s16, 256  ;;  %p2273_p6 = scmp.lt.s32.totalorder %s1661_s16, %s1661_s16 }
 0x171   : > { %p2267_p0 = scmp.ne.s32.totalorder %s1661_s16, %s2266_s0  ;;  %p2274_p7 = scmp.lt.s32.totalorder %s2266_s0, %s2266_s0 }
 0x173   : > { %p2268_p1 = pnand %p2267_p0, %p2079_p2  ;;  %p2275_p9 = por %p2274_p7, %p2273_p6 }
 0x175   : > { %p2269_p4 = pneg %p2268_p1 }
 0x177   : > { %p2276_p11 = pnand %p2275_p9, %p2269_p4 }
 0x179   : > { %2279 = shalt.err (!%p2276_p11)
}
 0x17a   : > { %s2280_s13 = scalar_lea.hbm %s3403_s10, 256 }
 0x17b   : > { %p2281_p13 = scmp.ne.s32.totalorder %s3403_s10, %s2280_s13  ;;  %p2286_p8 = scmp.lt.u32.totalorder %s2280_s13, %s3403_s10 }
 0x17d   : > { %p2282_p3 = pnand %p2281_p13, %p2079_p2 }
 0x17f   : > { %p2283_p5 = pneg %p2282_p3 }
 0x181   : > { %p2288_p10 = pnand %p2286_p8, %p2283_p5 }
 0x183   : > { %2291 = shalt.err (!%p2288_p10)
}
 0x184   : > { %2048 = dma.vmem_to_hbm [thread:$0]  (%p2079_p2), %s1661_s16, 256, %s3403_s10, [#allocation18]  }
 0x185   : > { %s2292_s29 = scalar_lea.vmem %s1689_s17, 128  ;;  %p2299_p4 = scmp.lt.s32.totalorder %s1689_s17, %s1689_s17 }
 0x186   : > { %p2293_p12 = scmp.ne.s32.totalorder %s1689_s17, %s2292_s29  ;;  %p2300_p6 = scmp.lt.s32.totalorder %s2292_s29, %s2292_s29 }
 0x188   : > { %p2294_p0 = pnand %p2293_p12, %p2079_p2  ;;  %p2301_p7 = por %p2300_p6, %p2299_p4 }
 0x18a   : > { %p2295_p1 = pneg %p2294_p0 }
 0x18c   : > { %p2302_p9 = pnand %p2301_p7, %p2295_p1 }
 0x18e   : > { %2305 = shalt.err (!%p2302_p9)
}
 0x18f   : > { %s2306_s23 = scalar_lea.hbm %s3405_s12, 128 }
 0x190   : > { %p2307_p11 = scmp.ne.s32.totalorder %s3405_s12, %s2306_s23  ;;  %p2312_p5 = scmp.lt.u32.totalorder %s2306_s23, %s3405_s12 }
 0x192   : > { %p2308_p13 = pnand %p2307_p11, %p2079_p2 }
 0x194   : > { %p2309_p3 = pneg %p2308_p13 }
 0x196   : > { %p2314_p8 = pnand %p2312_p5, %p2309_p3 }
 0x198   : > { %2317 = shalt.err (!%p2314_p8)
}
 0x199   : > { %2052 = dma.vmem_to_hbm [thread:$0]  (%p2079_p2), %s1689_s17, 128, %s3405_s12, [#allocation21]  }
 0x19a   : > { %s2552_s21 = smov [#allocation10]   ;;  %s2553_s28 = smov [#allocation13]  }
 0x19b   : > { %s1590_s13 = sshll.u32 %s2552_s21, 4  ;;  %s1618_s19 = sshll.u32 %s2553_s28, 4  ;;  %s1591_s13 = int_to_ptr.vmem [resolvable:$true] %s1590_s13  ;;  %s3251_s19 = int_to_ptr.vmem [resolvable:$true] %s1618_s19 }
 0x19c   : > { %s2318_s4 = scalar_lea.vmem %s1591_s13, 256  ;;  %p2325_p1 = scmp.lt.s32.totalorder %s1591_s13, %s1591_s13 }
 0x19d   : > { %p2319_p10 = scmp.ne.s32.totalorder %s1591_s13, %s2318_s4  ;;  %p2326_p4 = scmp.lt.s32.totalorder %s2318_s4, %s2318_s4 }
 0x19f   : > { %p2320_p12 = pnand %p2319_p10, %p2079_p2  ;;  %p2327_p6 = por %p2326_p4, %p2325_p1 }
 0x1a1   : > { %p2321_p0 = pneg %p2320_p12 }
 0x1a3   : > { %p2328_p7 = pnand %p2327_p6, %p2321_p0 }
 0x1a5   : > { %2331 = shalt.err (!%p2328_p7)
}
 0x1a6   : > { %s2332_s17 = scalar_lea.hbm %s3398_s5, 256 }
 0x1a7   : > { %p2333_p9 = scmp.ne.s32.totalorder %s3398_s5, %s2332_s17  ;;  %p2338_p3 = scmp.lt.u32.totalorder %s2332_s17, %s3398_s5 }
 0x1a9   : > { %p2334_p11 = pnand %p2333_p9, %p2079_p2 }
 0x1ab   : > { %p2335_p13 = pneg %p2334_p11 }
 0x1ad   : > { %p2340_p5 = pnand %p2338_p3, %p2335_p13 }
 0x1af   : > { %2343 = shalt.err (!%p2340_p5)
}
 0x1b0   : > { %2038 = dma.vmem_to_hbm [thread:$0]  (%p2079_p2), %s1591_s13, 256, %s3398_s5, [#allocation4]  }
 0x1b1   : > { %s2344_s18 = scalar_lea.vmem %s3251_s19, 256  ;;  %p2351_p0 = scmp.lt.s32.totalorder %s3251_s19, %s3251_s19 }
 0x1b2   : > { %p2345_p8 = scmp.ne.s32.totalorder %s3251_s19, %s2344_s18  ;;  %p2352_p1 = scmp.lt.s32.totalorder %s2344_s18, %s2344_s18 }
 0x1b4   : > { %p2346_p10 = pnand %p2345_p8, %p2079_p2  ;;  %p2353_p4 = por %p2352_p1, %p2351_p0 }
 0x1b6   : > { %p2347_p12 = pneg %p2346_p10 }
 0x1b8   : > { %p2354_p6 = pnand %p2353_p4, %p2347_p12 }
 0x1ba   : > { %2357 = shalt.err (!%p2354_p6)
}
 0x1bb   : > { %s2358_s0 = scalar_lea.hbm %s3400_s7, 256 }
 0x1bc   : > { %p2359_p7 = scmp.ne.s32.totalorder %s3400_s7, %s2358_s0  ;;  %p2364_p13 = scmp.lt.u32.totalorder %s2358_s0, %s3400_s7 }
 0x1be   : > { %p2360_p9 = pnand %p2359_p7, %p2079_p2 }
 0x1c0   : > { %p2361_p11 = pneg %p2360_p9 }
 0x1c2   : > { %p2366_p3 = pnand %p2364_p13, %p2361_p11 }
 0x1c4   : > { %2369 = shalt.err (!%p2366_p3)
}
 0x1c5   : > { %2042 = dma.vmem_to_hbm [thread:$0]  (%p2079_p2), %s3251_s19, 256, %s3400_s7, [#allocation12]  }
 0x1c6   : > { %s2554_s25 = smov [#allocation16]   ;;  %s2555_s27 = smov [#allocation19]  }
 0x1c7   : > { %s1646_s17 = sshll.u32 %s2554_s25, 4  ;;  %s1674_s29 = sshll.u32 %s2555_s27, 4  ;;  %s1647_s17 = int_to_ptr.vmem [resolvable:$true] %s1646_s17  ;;  %s3294_s29 = int_to_ptr.vmem [resolvable:$true] %s1674_s29 }
 0x1c8   : > { %s2370_s11 = scalar_lea.vmem %s1647_s17, 256  ;;  %p2377_p12 = scmp.lt.s32.totalorder %s1647_s17, %s1647_s17 }
 0x1c9   : > { %p2371_p5 = scmp.ne.s32.totalorder %s1647_s17, %s2370_s11  ;;  %p2378_p0 = scmp.lt.s32.totalorder %s2370_s11, %s2370_s11 }
 0x1cb   : > { %p2372_p8 = pnand %p2371_p5, %p2079_p2  ;;  %p2379_p1 = por %p2378_p0, %p2377_p12 }
 0x1cd   : > { %p2373_p10 = pneg %p2372_p8 }
 0x1cf   : > { %p2380_p4 = pnand %p2379_p1, %p2373_p10 }
 0x1d1   : > { %2383 = shalt.err (!%p2380_p4)
}
 0x1d2   : > { %s3437_s19 = sld [smem:[#allocation46_spill]] }
 0x1d8   : > { %s2384_s15 = scalar_lea.hbm %s3437_s19, 256 }
 0x1d9   : > { %p2385_p6 = scmp.ne.s32.totalorder %s3437_s19, %s2384_s15  ;;  %p2390_p11 = scmp.lt.u32.totalorder %s2384_s15, %s3437_s19 }
 0x1db   : > { %p2386_p7 = pnand %p2385_p6, %p2079_p2 }
 0x1dd   : > { %p2387_p9 = pneg %p2386_p7 }
 0x1df   : > { %p2392_p13 = pnand %p2390_p11, %p2387_p9 }
 0x1e1   : > { %2395 = shalt.err (!%p2392_p13)
}
 0x1e2   : > { %2046 = dma.vmem_to_hbm [thread:$0]  (%p2079_p2), %s1647_s17, 256, %s3437_s19, [#allocation15]  }
 0x1e3   : > { %s2396_s13 = scalar_lea.vmem %s3294_s29, 128  ;;  %p2403_p10 = scmp.lt.s32.totalorder %s3294_s29, %s3294_s29 }
 0x1e4   : > { %p2397_p3 = scmp.ne.s32.totalorder %s3294_s29, %s2396_s13  ;;  %p2404_p12 = scmp.lt.s32.totalorder %s2396_s13, %s2396_s13 }
 0x1e6   : > { %p2398_p5 = pnand %p2397_p3, %p2079_p2  ;;  %p2405_p0 = por %p2404_p12, %p2403_p10 }
 0x1e8   : > { %p2399_p8 = pneg %p2398_p5 }
 0x1ea   : > { %p2406_p1 = pnand %p2405_p0, %p2399_p8 }
 0x1ec   : > { %2409 = shalt.err (!%p2406_p1)
}
 0x1ed   : > { %s3438_s22 = sld [smem:[#allocation47_spill]] }
 0x1f3   : > { %s2410_s25 = scalar_lea.hbm %s3438_s22, 128 }
 0x1f4   : > { %p2411_p4 = scmp.ne.s32.totalorder %s3438_s22, %s2410_s25  ;;  %p2416_p9 = scmp.lt.u32.totalorder %s2410_s25, %s3438_s22 }
 0x1f6   : > { %p2412_p6 = pnand %p2411_p4, %p2079_p2 }
 0x1f8   : > { %p2413_p7 = pneg %p2412_p6 }
 0x1fa   : > { %p2418_p11 = pnand %p2416_p9, %p2413_p7 }
 0x1fc   : > { %2421 = shalt.err (!%p2418_p11)
}
 0x1fd   : > { %2050 = dma.vmem_to_hbm [thread:$0]  (%p2079_p2), %s3294_s29, 128, %s3438_s22, [#allocation18]  }
 0x1fe   : > { %s2556_s18 = smov [#allocation22]  }
 0x1ff   : > { %s1702_s16 = sshll.u32 %s2556_s18, 4  ;;  %s1703_s16 = int_to_ptr.vmem [resolvable:$true] %s1702_s16 }
 0x200   : > { %s2422_s20 = scalar_lea.vmem %s1703_s16, 128  ;;  %p2429_p8 = scmp.lt.s32.totalorder %s1703_s16, %s1703_s16 }
 0x201   : > { %p2423_p13 = scmp.ne.s32.totalorder %s1703_s16, %s2422_s20  ;;  %p2430_p10 = scmp.lt.s32.totalorder %s2422_s20, %s2422_s20 }
 0x203   : > { %p2424_p3 = pnand %p2423_p13, %p2079_p2  ;;  %p2431_p12 = por %p2430_p10, %p2429_p8 }
 0x205   : > { %p2425_p5 = pneg %p2424_p3 }
 0x207   : > { %p2432_p0 = pnand %p2431_p12, %p2425_p5 }
 0x209   : > { %2435 = shalt.err (!%p2432_p0)
}
 0x20a   : > { %s3439_s21 = sld [smem:[#allocation48_spill]] }
 0x210   : > { %s2436_s13 = scalar_lea.hbm %s3439_s21, 128 }
 0x211   : > { %p2437_p1 = scmp.ne.s32.totalorder %s3439_s21, %s2436_s13  ;;  %p2442_p7 = scmp.lt.u32.totalorder %s2436_s13, %s3439_s21 }
 0x213   : > { %p2438_p4 = pnand %p2437_p1, %p2079_p2 }
 0x215   : > { %p2439_p6 = pneg %p2438_p4 }
 0x217   : > { %p2444_p9 = pnand %p2442_p7, %p2439_p6 }
 0x219   : > { %2447 = shalt.err (!%p2444_p9)
}
 0x21a   : > { %2054 = dma.vmem_to_hbm [thread:$0]  (%p2079_p2), %s1703_s16, 128, %s3439_s21, [#allocation21]  }
 0x21b   : > { %2485 = dma.done.wait (%p2079_p2), [#allocation4], 256  }
 0x21c   : > { %2487 = vsyncadd (%p2079_p2), [#allocation4], 4294967040 }
 0x21d   : > { %2489 = dma.done.wait (%p2079_p2), [#allocation12], 512  }
 0x21e   : > { %2491 = vsyncadd (%p2079_p2), [#allocation12], 4294966784 }
 0x21f   : > { %2493 = dma.done.wait (%p2079_p2), [#allocation15], 512  }
 0x220   : > { %2495 = vsyncadd (%p2079_p2), [#allocation15], 4294966784 }
 0x221   : > { %2497 = dma.done.wait (%p2079_p2), [#allocation18], 384  }
 0x222   : > { %2499 = vsyncadd (%p2079_p2), [#allocation18], 4294966912 }
 0x223   : > { %2501 = dma.done.wait (%p2079_p2), [#allocation21], 256  }
 0x224   : > { %2503 = vsyncadd (%p2079_p2), [#allocation21], 4294967040 }
 0x225 PF: > { %s36_s30 = sadd.s32 1, %s2526_s30   ;;  %s3440_s17 = sld [smem:[#allocation40_spill]] }
 0x226   : > { %p33_p11 = scmp.ge.s32.totalorder %s36_s30, 6   ;;  %s3441_s27 = sld [smem:[#allocation43_spill]] }
 0x227   : > { %s3442_s28 = sld [smem:[#allocation41_spill]]  ;;  %s3443_s29 = sld [smem:[#allocation42_spill]] }
 0x228   : > { %s3444_s25 = smov %s2510_s26  ;;  %35 = sbr.rel (!%p33_p11) target bundleno = 18 (0x12), region = 209 }
 0x22b   : > { %s3445_s26 = smov %s3440_s17 }
 0x22f   :  { %1747 = vsyncpa [#allocation3], 1 }
 0x230   :  { %1749 = vsyncpa [#allocation3 + $0x1], 1 }
 0x231   :  { %1750 = vsyncpa [#allocation6], 1 }
 0x232   :  { %1752 = vsyncpa [#allocation6 + $0x1], 1 }
 0x233   :  { %1753 = vsyncpa [#allocation9], 1 }
 0x234   :  { %1754 = vsyncpa [#allocation4], 1 }
 0x235   :  { %1756 = vsyncpa [#allocation4 + $0x1], 1 }
 0x236   :  { %1757 = vsyncpa [#allocation12], 1 }
 0x237   :  { %1758 = vsyncpa [#allocation15], 1 }
 0x238   :  { %1759 = vsyncpa [#allocation18], 1 }
 0x239   :  { %1760 = vsyncpa [#allocation21], 1 }

</bundles_post_ra>
